<compile_context>
chip_gen: v7x
topology: tpu7x:2x2x1
jax: 0.10.0
libtpu: 0.0.40
codegen_flags: <defaults>
</compile_context>

<pallas_src>
import functools

import jax
import jax.numpy as jnp
from jax.experimental import pallas as pl
from jax.experimental.pallas import tpu as pltpu

NHEAD = 4
LN_EPS = 1e-5
NEG_INF = -1e9


# ----------------------------------------------------------------------------
# Fused branch kernel: one grid step = one transformer layer of one batch block
# ----------------------------------------------------------------------------
def branch_kernel(
    x_ref, maskadd_ref, valid_ref,
    pw_ref, pb_ref,
    win_ref, bin_ref, wo_ref, bo_ref,
    ln1g_ref, ln1b_ref, w1_ref, b1_ref, w2_ref, b2_ref,
    ln2g_ref, ln2b_ref,
    tok_ref, agg_ref,
    h_ref,
    *, bb, seq, embed, n_masked, n_layers,
):
    l = pl.program_id(1)
    dh = embed // NHEAD
    M = bb * seq

    # ---- layer 0 of each batch block: fused input projection into scratch ----
    @pl.when(l == 0)
    def _():
        h_ref[...] = (
            jnp.dot(x_ref[...].astype(jnp.bfloat16), pw_ref[...],
                    preferred_element_type=jnp.float32) + pb_ref[...])

    h = h_ref[...]                                             # (M, E) f32

    # ---------------- multi-head self-attention ----------------
    # ONE fused (M, E) @ (E, 3E) QKV projection; 1/sqrt(dh) pre-folded into q.
    qkv = (jnp.dot(h.astype(jnp.bfloat16), win_ref[...],
                   preferred_element_type=jnp.float32) + bin_ref[...])
    qkv_b = qkv.astype(jnp.bfloat16)                           # (M, 3E)

    def split_heads(base):                                     # -> (H*bb, S, dh)
        hm = jnp.stack(
            [qkv_b[:, base + hd * dh: base + (hd + 1) * dh] for hd in range(NHEAD)],
            axis=0)                                            # (H, M, dh)
        return hm.reshape(NHEAD * bb, seq, dh)                 # head-major, then batch

    qh = split_heads(0)
    kh = split_heads(embed)
    vh = split_heads(2 * embed)

    s = jnp.einsum('nqd,nkd->nqk', qh, kh,
                   preferred_element_type=jnp.float32)         # (H*bb, S, S) f32

    # additive key-padding mask, only for the first n_masked layers (gated)
    gate = (l < n_masked).astype(jnp.float32)
    s = (s.reshape(NHEAD, bb, seq, seq)
         + (maskadd_ref[...] * gate)[None, :, None, :]
         ).reshape(NHEAD * bb, seq, seq)

    s = s - jnp.max(s, axis=-1, keepdims=True)
    p = jnp.exp(s)
    p = p * pl.reciprocal(jnp.sum(p, axis=-1, keepdims=True), approx=True)

    ctx = jnp.einsum('nqk,nkd->nqd', p.astype(jnp.bfloat16), vh,
                     preferred_element_type=jnp.float32)       # (H*bb, S, dh)
    ctx = ctx.reshape(NHEAD, M, dh)
    ctx_cat = jnp.concatenate([ctx[hd] for hd in range(NHEAD)], axis=-1)  # (M, E)

    attn = (jnp.dot(ctx_cat.astype(jnp.bfloat16), wo_ref[...],
                    preferred_element_type=jnp.float32) + bo_ref[...])    # (M, E)

    # ---------------- residual + LayerNorm 1 (one-pass stats) ----------------
    y = h + attn
    mu = jnp.mean(y, axis=-1, keepdims=True)
    var = jnp.maximum(jnp.mean(y * y, axis=-1, keepdims=True) - mu * mu, 0.0)
    y = (y - mu) * jax.lax.rsqrt(var + LN_EPS) * ln1g_ref[...] + ln1b_ref[...]

    # ---------------- feed-forward (relu) ----------------
    h1 = jnp.maximum(
        jnp.dot(y.astype(jnp.bfloat16), w1_ref[...],
                preferred_element_type=jnp.float32) + b1_ref[...], 0.0)    # (M, FF)
    h2 = (jnp.dot(h1.astype(jnp.bfloat16), w2_ref[...],
                  preferred_element_type=jnp.float32) + b2_ref[...])       # (M, E)

    # ---------------- residual + LayerNorm 2 ----------------
    z = y + h2
    mu = jnp.mean(z, axis=-1, keepdims=True)
    var = jnp.maximum(jnp.mean(z * z, axis=-1, keepdims=True) - mu * mu, 0.0)
    hn = (z - mu) * jax.lax.rsqrt(var + LN_EPS) * ln2g_ref[...] + ln2b_ref[...]

    h_ref[...] = hn

    # ---- epilogue (last layer): masked-mean agg + l2norm, token l2norm ----
    @pl.when(l == n_layers - 1)
    def _():
        valid = valid_ref[...]                                  # (bb, S)
        h3 = hn.reshape(bb, seq, embed)
        summ = jnp.sum(h3 * valid[:, :, None], axis=1)          # (bb, E)
        cnt = jnp.maximum(jnp.sum(valid, axis=-1, keepdims=True), 1.0)
        mean = summ * pl.reciprocal(cnt, approx=True)
        agg_ref[...] = mean * jax.lax.rsqrt(
            jnp.maximum(jnp.sum(mean * mean, axis=-1, keepdims=True), 1e-24))

        tok = hn * jax.lax.rsqrt(
            jnp.maximum(jnp.sum(hn * hn, axis=-1, keepdims=True), 1e-24))
        tok3 = tok.reshape(bb, seq, embed)
        # lane-dense (bb, S*E) token slab -> unmasked stores; wrapper reshapes back
        tok_ref[...] = jnp.concatenate(
            [tok3[:, s2, :] for s2 in range(seq)], axis=-1)


# ----------------------------------------------------------------------------
# Wrapper: one pallas_call per branch, grid = (batch blocks, layers)
# ----------------------------------------------------------------------------
def _pick_batch_block(B, S):
    # keep (batch_block * S, FF) FFN intermediate bounded; keep blocks aligned
    limit = max(1, 256 // S)
    if B <= limit:
        return B
    for cand in range(min(B, limit), 0, -1):
        if B % cand == 0 and (cand % 8 == 0) and ((cand * S) % 8 == 0):
            return cand
    return B


def run_branch(x, mask_add, valid, proj_w_t, proj_b, stacked, *, n_masked, n_layers):
    B, S, Din = x.shape
    E = proj_w_t.shape[1]
    FF = stacked["w1"].shape[-1]
    x_flat = x.reshape(B * S, Din).astype(jnp.float32)

    # pad projection contraction dim to a multiple of 128 (lane-dense loads)
    pad = (-Din) % 128
    if pad:
        x_flat = jnp.pad(x_flat, ((0, 0), (0, pad)))
        proj_w_t = jnp.pad(proj_w_t, ((0, pad), (0, 0)))
    Dp = Din + pad
    pw = proj_w_t.astype(jnp.bfloat16)
    pb = proj_b.reshape(1, E).astype(jnp.float32)

    bb = _pick_batch_block(B, S)
    nb = B // bb

    kernel = functools.partial(
        branch_kernel, bb=bb, seq=S, embed=E,
        n_masked=n_masked, n_layers=n_layers)

    # per-layer weight streaming: index_map selects layer l of the stacked slabs
    def wspec(d1, d2):
        return pl.BlockSpec((None, d1, d2), lambda b, l: (l, 0, 0))

    in_specs = [
        pl.BlockSpec((bb * S, Dp), lambda b, l: (b, 0)),   # x
        pl.BlockSpec((bb, S), lambda b, l: (b, 0)),        # additive mask
        pl.BlockSpec((bb, S), lambda b, l: (b, 0)),        # valid
        pl.BlockSpec((Dp, E), lambda b, l: (0, 0)),        # proj W
        pl.BlockSpec((1, E), lambda b, l: (0, 0)),         # proj b
        wspec(E, 3 * E),                                   # win
        wspec(1, 3 * E),                                   # bin
        wspec(E, E),                                       # wo
        wspec(1, E),                                       # bo
        wspec(1, E), wspec(1, E),                          # ln1 g/b
        wspec(E, FF),                                      # w1
        wspec(1, FF),                                      # b1
        wspec(FF, E),                                      # w2
        wspec(1, E),                                       # b2
        wspec(1, E), wspec(1, E),                          # ln2 g/b
    ]
    out_specs = (
        pl.BlockSpec((bb, S * E), lambda b, l: (b, 0)),    # lane-dense tokens
        pl.BlockSpec((bb, E), lambda b, l: (b, 0)),        # aggregated embedding
    )

    grid_spec = pltpu.PrefetchScalarGridSpec(
        num_scalar_prefetch=0,
        grid=(nb, n_layers),
        in_specs=in_specs,
        out_specs=out_specs,
        scratch_shapes=[pltpu.VMEM((bb * S, E), jnp.float32)],  # carried activation
    )

    tok2d, agg = pl.pallas_call(
        kernel,
        out_shape=(jax.ShapeDtypeStruct((B, S * E), jnp.float32),
                   jax.ShapeDtypeStruct((B, E), jnp.float32)),
        grid_spec=grid_spec,
        compiler_params=pltpu.CompilerParams(
            dimension_semantics=("parallel", "arbitrary"),
            vmem_limit_bytes=48 * 1024 * 1024),
    )(x_flat, mask_add, valid, pw, pb,
      stacked["win"], stacked["bin"], stacked["wo"], stacked["bo"],
      stacked["ln1g"], stacked["ln1b"],
      stacked["w1"], stacked["b1"], stacked["w2"], stacked["b2"],
      stacked["ln2g"], stacked["ln2b"])

    return tok2d.reshape(B, S, E), agg


# ----------------------------------------------------------------------------
# Wrapper-side parameter layout prep (pre-transposed, bf16, scale folded)
# ----------------------------------------------------------------------------
def prepare_branch_params(layers_masked, layers_free, E):
    dh = E // NHEAD
    scale = 1.0 / float(dh) ** 0.5
    layers = list(layers_masked) + list(layers_free)
    keys = ("win", "bin", "wo", "bo", "ln1g", "ln1b",
            "w1", "b1", "w2", "b2", "ln2g", "ln2b")
    acc = {k: [] for k in keys}
    # fold 1/sqrt(dh) into the q third of the fused in-projection
    q_scale = jnp.concatenate([jnp.full((E,), scale, jnp.float32),
                               jnp.ones((2 * E,), jnp.float32)])
    for p in layers:
        in_w = p["in_w"] * q_scale[:, None]                  # (3E, E)
        in_b = p["in_b"] * q_scale                           # (3E,)
        acc["win"].append(in_w.T.astype(jnp.bfloat16))       # (E, 3E), x @ win
        acc["bin"].append(in_b.reshape(1, 3 * E).astype(jnp.float32))
        acc["wo"].append(p["out_w"].T.astype(jnp.bfloat16))  # (E, E)
        acc["bo"].append(p["out_b"].reshape(1, E).astype(jnp.float32))
        acc["ln1g"].append(p["ln1_g"].reshape(1, E))
        acc["ln1b"].append(p["ln1_b"].reshape(1, E))
        acc["w1"].append(p["w1"].T.astype(jnp.bfloat16))     # (E, FF)
        acc["b1"].append(p["b1"].reshape(1, -1).astype(jnp.float32))
        acc["w2"].append(p["w2"].T.astype(jnp.bfloat16))     # (FF, E)
        acc["b2"].append(p["b2"].reshape(1, E).astype(jnp.float32))
        acc["ln2g"].append(p["ln2_g"].reshape(1, E))
        acc["ln2b"].append(p["ln2_b"].reshape(1, E))
    return {k: jnp.stack(v, axis=0) for k, v in acc.items()}


# ----------------------------------------------------------------------------
# Parameter init (deterministic, mirrors the module's __init__ shapes)
# ----------------------------------------------------------------------------
def init_linear(key, dout, din):
    w = jax.random.normal(key, (dout, din), jnp.float32) * 0.02
    b = jnp.zeros((dout,), jnp.float32)
    return w, b


def init_encoder_layer(key, E, FF):
    ks = jax.random.split(key, 4)
    in_w, in_b = init_linear(ks[0], 3 * E, E)
    out_w, out_b = init_linear(ks[1], E, E)
    w1, b1 = init_linear(ks[2], FF, E)
    w2, b2 = init_linear(ks[3], E, FF)
    return dict(
        in_w=in_w, in_b=in_b, out_w=out_w, out_b=out_b,
        ln1_g=jnp.ones((E,), jnp.float32), ln1_b=jnp.zeros((E,), jnp.float32),
        w1=w1, b1=b1, w2=w2, b2=b2,
        ln2_g=jnp.ones((E,), jnp.float32), ln2_b=jnp.zeros((E,), jnp.float32),
    )


def init_params(key, *, embed_size, word_dim, feat_dim, layers, ff):
    keys = jax.random.split(key, 2 + 4 * layers)
    cap_w, cap_b = init_linear(keys[0], embed_size, word_dim)
    img_w, img_b = init_linear(keys[1], embed_size, feat_dim)
    kiter = iter(keys[2:])
    return dict(
        embed_size=embed_size,
        cap_proj_w=cap_w, cap_proj_b=cap_b,
        img_proj_w=img_w, img_proj_b=img_b,
        enc1=[init_encoder_layer(next(kiter), embed_size, ff) for _ in range(layers)],
        enc2=[init_encoder_layer(next(kiter), embed_size, ff) for _ in range(layers)],
        enc_text=[init_encoder_layer(next(kiter), embed_size, ff) for _ in range(layers)],
        enc_img=[init_encoder_layer(next(kiter), embed_size, ff) for _ in range(layers)],
    )


# ----------------------------------------------------------------------------
# Forward (mirrors JointTextImageTransformerEncoder.forward)
# ----------------------------------------------------------------------------
def forward(params, features, captions, feat_len, cap_len, boxes):
    del boxes  # TODO(synk): EncoderImage consumes boxes; pass-through stand-in ignores them.
    E = params["embed_size"]
    L = len(params["enc1"])

    # txt_enc / img_enc stand-ins (pass-through of featurized inputs)
    c_emb = captions                      # (B, S_cap, word_dim)
    i_emb = features                      # (B, S_img, feat_dim)

    # ---------------- text branch: cap_proj -> enc1(masked) -> enc_text -> agg ----------------
    Sc = c_emb.shape[1]
    cap_pad = jnp.arange(Sc)[None, :] >= cap_len[:, None]             # True = pad
    cap_mask_add = jnp.where(cap_pad, NEG_INF, 0.0).astype(jnp.float32)
    cap_valid = (~cap_pad).astype(jnp.float32)
    cap_stacked = prepare_branch_params(params["enc1"], params["enc_text"], E)
    # .detach() between enc1 and enc_text is a forward no-op (fused here).
    cap_tok, cap_aggr = run_branch(
        c_emb, cap_mask_add, cap_valid,
        params["cap_proj_w"].T, params["cap_proj_b"], cap_stacked,
        n_masked=L, n_layers=2 * L)

    # ---------------- image branch (shared_transformer=False) ----------------
    Si = i_emb.shape[1]
    img_pad = jnp.arange(Si)[None, :] >= feat_len[:, None]
    img_mask_add = jnp.where(img_pad, NEG_INF, 0.0).astype(jnp.float32)
    img_valid = (~img_pad).astype(jnp.float32)
    img_stacked = prepare_branch_params(params["enc2"], params["enc_img"], E)
    img_tok, img_aggr = run_branch(
        i_emb, img_mask_add, img_valid,
        params["img_proj_w"].T, params["img_proj_b"], img_stacked,
        n_masked=L, n_layers=2 * L)

    # istest=False path: tokens are the l2-normalized full1_* embeddings.
    # Back to PyTorch (S, B, E) convention; row 0 = aggregated embedding.
    full_img_out = jnp.transpose(img_tok, (1, 0, 2)).at[0].set(img_aggr)
    full_cap_out = jnp.transpose(cap_tok, (1, 0, 2)).at[0].set(cap_aggr)

    return img_aggr, cap_aggr, full_img_out, full_cap_out


# ----------------------------------------------------------------------------
if __name__ == "__main__":
    # small config
    B = 2
    S_CAP, WORD_DIM = 8, 48
    S_IMG, FEAT_DIM = 16, 64
    EMBED = 32
    LAYERS = 1
    FF = 2048  # dim_feedforward hard-coded in the module

    key = jax.random.PRNGKey(0)
    k_par, k_feat, k_cap, k_box = jax.random.split(key, 4)

    params = init_params(
        k_par, embed_size=EMBED, word_dim=WORD_DIM, feat_dim=FEAT_DIM,
        layers=LAYERS, ff=FF)

    features = jax.random.normal(k_feat, (B, S_IMG, FEAT_DIM), jnp.float32)
    captions = jax.random.normal(k_cap, (B, S_CAP, WORD_DIM), jnp.float32)
    boxes = jax.random.normal(k_box, (B, S_IMG, 4), jnp.float32)
    feat_len = jnp.array([S_IMG, 12], jnp.int32)
    cap_len = jnp.array([S_CAP, 6], jnp.int32)

    img_aggr, cap_aggr, full_img, full_cap = forward(
        params, features, captions, feat_len, cap_len, boxes)
    jax.block_until_ready((img_aggr, cap_aggr, full_img, full_cap))

    assert img_aggr.shape == (B, EMBED)
    assert cap_aggr.shape == (B, EMBED)
    assert full_img.shape == (S_IMG, B, EMBED)
    assert full_cap.shape == (S_CAP, B, EMBED)
    assert bool(jnp.all(jnp.isfinite(full_img)))
    assert bool(jnp.all(jnp.isfinite(full_cap)))
    print("KERNEL_OK")
</pallas_src>

<mosaic_0001>
module attributes {stable_mosaic.version = 11 : i64} {
  func.func @branch_kernel(%arg0: i32, %arg1: i32, %arg2: memref<16x128xf32, #tpu.memory_space<vmem>>, %arg3: memref<2x8xf32, #tpu.memory_space<vmem>>, %arg4: memref<2x8xf32, #tpu.memory_space<vmem>>, %arg5: memref<128x32xbf16, #tpu.memory_space<vmem>>, %arg6: memref<1x32xf32, #tpu.memory_space<vmem>>, %arg7: memref<1x32x96xbf16, #tpu.memory_space<vmem>>, %arg8: memref<1x1x96xf32, #tpu.memory_space<vmem>>, %arg9: memref<1x32x32xbf16, #tpu.memory_space<vmem>>, %arg10: memref<1x1x32xf32, #tpu.memory_space<vmem>>, %arg11: memref<1x1x32xf32, #tpu.memory_space<vmem>>, %arg12: memref<1x1x32xf32, #tpu.memory_space<vmem>>, %arg13: memref<1x32x2048xbf16, #tpu.memory_space<vmem>>, %arg14: memref<1x1x2048xf32, #tpu.memory_space<vmem>>, %arg15: memref<1x2048x32xbf16, #tpu.memory_space<vmem>>, %arg16: memref<1x1x32xf32, #tpu.memory_space<vmem>>, %arg17: memref<1x1x32xf32, #tpu.memory_space<vmem>>, %arg18: memref<1x1x32xf32, #tpu.memory_space<vmem>>, %arg19: memref<2x256xf32, #tpu.memory_space<vmem>>, %arg20: memref<2x32xf32, #tpu.memory_space<vmem>>, %arg21: memref<16x32xf32, #tpu.memory_space<vmem>>) attributes {dimension_semantics = [#tpu.dimension_semantics<parallel>, #tpu.dimension_semantics<arbitrary>], iteration_bounds = array<i64: 1, 2>, scalar_prefetch = 0 : i64, scratch_operands = 1 : i64, tpu.core_type = #tpu.core_type<tc>, window_params = [{transform_indices = @transform_0, window_bounds = array<i64: 16, 128>}, {transform_indices = @transform_1, window_bounds = array<i64: 2, 8>}, {transform_indices = @transform_2, window_bounds = array<i64: 2, 8>}, {pipeline_mode = #tpu.pipeline_mode<synchronous>, transform_indices = @transform_3, window_bounds = array<i64: 128, 32>}, {pipeline_mode = #tpu.pipeline_mode<synchronous>, transform_indices = @transform_4, window_bounds = array<i64: 1, 32>}, {transform_indices = @transform_5, window_bounds = array<i64: 1, 32, 96>}, {transform_indices = @transform_6, window_bounds = array<i64: 1, 1, 96>}, {transform_indices = @transform_7, window_bounds = array<i64: 1, 32, 32>}, {transform_indices = @transform_8, window_bounds = array<i64: 1, 1, 32>}, {transform_indices = @transform_9, window_bounds = array<i64: 1, 1, 32>}, {transform_indices = @transform_10, window_bounds = array<i64: 1, 1, 32>}, {transform_indices = @transform_11, window_bounds = array<i64: 1, 32, 2048>}, {transform_indices = @transform_12, window_bounds = array<i64: 1, 1, 2048>}, {transform_indices = @transform_13, window_bounds = array<i64: 1, 2048, 32>}, {transform_indices = @transform_14, window_bounds = array<i64: 1, 1, 32>}, {transform_indices = @transform_15, window_bounds = array<i64: 1, 1, 32>}, {transform_indices = @transform_16, window_bounds = array<i64: 1, 1, 32>}, {transform_indices = @transform_17, window_bounds = array<i64: 2, 256>}, {transform_indices = @transform_18, window_bounds = array<i64: 2, 32>}]} {
    %c0_i32 = arith.constant 0 : i32
    %0 = arith.cmpi eq, %arg1, %c0_i32 : i32
    %1 = arith.extui %0 : i1 to i32
    %c0_i32_0 = arith.constant 0 : i32
    %2 = arith.cmpi ne, %1, %c0_i32_0 : i32
    scf.if %2 {
      %c0_64 = arith.constant 0 : index
      %c0_65 = arith.constant 0 : index
      %165 = vector.load %arg2[%c0_64, %c0_65] : memref<16x128xf32, #tpu.memory_space<vmem>>, vector<16x128xf32>
      %166 = arith.truncf %165 : vector<16x128xf32> to vector<16x128xbf16>
      %c0_66 = arith.constant 0 : index
      %c0_67 = arith.constant 0 : index
      %167 = vector.load %arg5[%c0_66, %c0_67] : memref<128x32xbf16, #tpu.memory_space<vmem>>, vector<128x32xbf16>
      %cst_68 = arith.constant dense<0.000000e+00> : vector<16x32xf32>
      %168 = tpu.matmul %166, %167, %cst_68 {dimension_numbers = #tpu.dot_dimension_numbers<[1], [0], [0], [1], [0, 0, 1, 1], [], []>} : vector<16x128xbf16>, vector<128x32xbf16>, vector<16x32xf32> -> vector<16x32xf32>
      %c0_69 = arith.constant 0 : index
      %c0_70 = arith.constant 0 : index
      %169 = vector.load %arg6[%c0_69, %c0_70] : memref<1x32xf32, #tpu.memory_space<vmem>>, vector<1x32xf32>
      %170 = vector.broadcast %169 : vector<1x32xf32> to vector<16x32xf32>
      %171 = arith.addf %168, %170 : vector<16x32xf32>
      %c0_71 = arith.constant 0 : index
      %c0_72 = arith.constant 0 : index
      %172 = vector.load %arg21[%c0_71, %c0_72] : memref<16x32xf32, #tpu.memory_space<vmem>>, vector<16x32xf32>
      tpu.vector_store %arg21[%c0_71, %c0_72], %171 {strides = array<i32>} : memref<16x32xf32, #tpu.memory_space<vmem>>, vector<16x32xf32>,
    } else {
    }
    %c0 = arith.constant 0 : index
    %c0_1 = arith.constant 0 : index
    %3 = vector.load %arg21[%c0, %c0_1] : memref<16x32xf32, #tpu.memory_space<vmem>>, vector<16x32xf32>
    %4 = arith.truncf %3 : vector<16x32xf32> to vector<16x32xbf16>
    %c0_2 = arith.constant 0 : index
    %c0_3 = arith.constant 0 : index
    %c0_4 = arith.constant 0 : index
    %5 = vector.load %arg7[%c0_2, %c0_3, %c0_4] : memref<1x32x96xbf16, #tpu.memory_space<vmem>>, vector<1x32x96xbf16>
    %6 = vector.shape_cast %5 : vector<1x32x96xbf16> to vector<32x96xbf16>
    %cst = arith.constant dense<0.000000e+00> : vector<16x96xf32>
    %7 = tpu.matmul %4, %6, %cst {dimension_numbers = #tpu.dot_dimension_numbers<[1], [0], [0], [1], [0, 0, 1, 1], [], []>} : vector<16x32xbf16>, vector<32x96xbf16>, vector<16x96xf32> -> vector<16x96xf32>
    %c0_5 = arith.constant 0 : index
    %c0_6 = arith.constant 0 : index
    %c0_7 = arith.constant 0 : index
    %8 = vector.load %arg8[%c0_5, %c0_6, %c0_7] : memref<1x1x96xf32, #tpu.memory_space<vmem>>, vector<1x1x96xf32>
    %9 = vector.shape_cast %8 : vector<1x1x96xf32> to vector<1x96xf32>
    %10 = vector.broadcast %9 : vector<1x96xf32> to vector<16x96xf32>
    %11 = arith.addf %7, %10 : vector<16x96xf32>
    %12 = arith.truncf %11 : vector<16x96xf32> to vector<16x96xbf16>
    %13 = vector.extract_strided_slice %12 {offsets = [0, 0], sizes = [16, 8], strides = [1, 1]} : vector<16x96xbf16> to vector<16x8xbf16>
    %14 = vector.extract_strided_slice %12 {offsets = [0, 8], sizes = [16, 8], strides = [1, 1]} : vector<16x96xbf16> to vector<16x8xbf16>
    %15 = vector.extract_strided_slice %12 {offsets = [0, 16], sizes = [16, 8], strides = [1, 1]} : vector<16x96xbf16> to vector<16x8xbf16>
    %16 = vector.extract_strided_slice %12 {offsets = [0, 24], sizes = [16, 8], strides = [1, 1]} : vector<16x96xbf16> to vector<16x8xbf16>
    %17 = vector.shape_cast %13 : vector<16x8xbf16> to vector<1x16x8xbf16>
    %18 = vector.shape_cast %14 : vector<16x8xbf16> to vector<1x16x8xbf16>
    %19 = vector.shape_cast %15 : vector<16x8xbf16> to vector<1x16x8xbf16>
    %20 = vector.shape_cast %16 : vector<16x8xbf16> to vector<1x16x8xbf16>
    %21 = tpu.concatenate %17, %18, %19, %20 in 0 : vector<1x16x8xbf16>, vector<1x16x8xbf16>, vector<1x16x8xbf16>, vector<1x16x8xbf16> -> vector<4x16x8xbf16>
    %22 = vector.shape_cast %21 : vector<4x16x8xbf16> to vector<8x8x8xbf16>
    %23 = vector.extract_strided_slice %12 {offsets = [0, 32], sizes = [16, 8], strides = [1, 1]} : vector<16x96xbf16> to vector<16x8xbf16>
    %24 = vector.extract_strided_slice %12 {offsets = [0, 40], sizes = [16, 8], strides = [1, 1]} : vector<16x96xbf16> to vector<16x8xbf16>
    %25 = vector.extract_strided_slice %12 {offsets = [0, 48], sizes = [16, 8], strides = [1, 1]} : vector<16x96xbf16> to vector<16x8xbf16>
    %26 = vector.extract_strided_slice %12 {offsets = [0, 56], sizes = [16, 8], strides = [1, 1]} : vector<16x96xbf16> to vector<16x8xbf16>
    %27 = vector.shape_cast %23 : vector<16x8xbf16> to vector<1x16x8xbf16>
    %28 = vector.shape_cast %24 : vector<16x8xbf16> to vector<1x16x8xbf16>
    %29 = vector.shape_cast %25 : vector<16x8xbf16> to vector<1x16x8xbf16>
    %30 = vector.shape_cast %26 : vector<16x8xbf16> to vector<1x16x8xbf16>
    %31 = tpu.concatenate %27, %28, %29, %30 in 0 : vector<1x16x8xbf16>, vector<1x16x8xbf16>, vector<1x16x8xbf16>, vector<1x16x8xbf16> -> vector<4x16x8xbf16>
    %32 = vector.shape_cast %31 : vector<4x16x8xbf16> to vector<8x8x8xbf16>
    %33 = vector.extract_strided_slice %12 {offsets = [0, 64], sizes = [16, 8], strides = [1, 1]} : vector<16x96xbf16> to vector<16x8xbf16>
    %34 = vector.extract_strided_slice %12 {offsets = [0, 72], sizes = [16, 8], strides = [1, 1]} : vector<16x96xbf16> to vector<16x8xbf16>
    %35 = vector.extract_strided_slice %12 {offsets = [0, 80], sizes = [16, 8], strides = [1, 1]} : vector<16x96xbf16> to vector<16x8xbf16>
    %36 = vector.extract_strided_slice %12 {offsets = [0, 88], sizes = [16, 8], strides = [1, 1]} : vector<16x96xbf16> to vector<16x8xbf16>
    %37 = vector.shape_cast %33 : vector<16x8xbf16> to vector<1x16x8xbf16>
    %38 = vector.shape_cast %34 : vector<16x8xbf16> to vector<1x16x8xbf16>
    %39 = vector.shape_cast %35 : vector<16x8xbf16> to vector<1x16x8xbf16>
    %40 = vector.shape_cast %36 : vector<16x8xbf16> to vector<1x16x8xbf16>
    %41 = tpu.concatenate %37, %38, %39, %40 in 0 : vector<1x16x8xbf16>, vector<1x16x8xbf16>, vector<1x16x8xbf16>, vector<1x16x8xbf16> -> vector<4x16x8xbf16>
    %42 = vector.shape_cast %41 : vector<4x16x8xbf16> to vector<8x8x8xbf16>
    "tpu.trace_start"() <{level = 10 : i32, message = "nqd,nkd->nqk"}> : () -> ()
    %cst_8 = arith.constant dense<0.000000e+00> : vector<8x8x8xf32>
    %43 = tpu.matmul %22, %32, %cst_8 {dimension_numbers = #tpu.dot_dimension_numbers<[2], [2], [1], [1], [0, 0, 0, 1, 1, 1], [0], [0]>} : vector<8x8x8xbf16>, vector<8x8x8xbf16>, vector<8x8x8xf32> -> vector<8x8x8xf32>
    %c1_i32 = arith.constant 1 : i32
    "tpu.trace_stop"() : () -> ()
    %44 = arith.cmpi slt, %arg1, %c1_i32 : i32
    %45 = arith.extui %44 : i1 to i32
    %46 = arith.sitofp %45 : i32 to f32
    %47 = vector.shape_cast %43 : vector<8x8x8xf32> to vector<4x2x8x8xf32>
    %c0_9 = arith.constant 0 : index
    %c0_10 = arith.constant 0 : index
    %48 = vector.load %arg3[%c0_9, %c0_10] : memref<2x8xf32, #tpu.memory_space<vmem>>, vector<2x8xf32>
    %49 = vector.broadcast %46 : f32 to vector<2x8xf32>
    %50 = arith.mulf %48, %49 : vector<2x8xf32>
    %51 = vector.shape_cast %50 : vector<2x8xf32> to vector<1x2x1x8xf32>
    %52 = vector.broadcast %51 : vector<1x2x1x8xf32> to vector<4x2x8x8xf32>
    %53 = arith.addf %47, %52 : vector<4x2x8x8xf32>
    %54 = vector.shape_cast %53 : vector<4x2x8x8xf32> to vector<8x8x8xf32>
    %cst_11 = arith.constant dense<0xFF800000> : vector<8x8xf32>
    %55 = vector.multi_reduction <maximumf>, %54, %cst_11 [2] : vector<8x8x8xf32> to vector<8x8xf32>
    %56 = vector.shape_cast %55 : vector<8x8xf32> to vector<8x8x1xf32>
    %57 = vector.broadcast %56 : vector<8x8x1xf32> to vector<8x8x8xf32>
    %58 = arith.subf %54, %57 : vector<8x8x8xf32>
    %59 = math.exp %58 : vector<8x8x8xf32>
    %cst_12 = arith.constant dense<0.000000e+00> : vector<8x8xf32>
    %60 = vector.multi_reduction <add>, %59, %cst_12 [2] : vector<8x8x8xf32> to vector<8x8xf32>
    %61 = vector.shape_cast %60 : vector<8x8xf32> to vector<8x8x1xf32>
    %62 = tpu.reciprocal %61 {approx = true} : vector<8x8x1xf32> -> vector<8x8x1xf32>
    %63 = vector.broadcast %62 : vector<8x8x1xf32> to vector<8x8x8xf32>
    %64 = arith.mulf %59, %63 : vector<8x8x8xf32>
    %65 = arith.truncf %64 : vector<8x8x8xf32> to vector<8x8x8xbf16>
    "tpu.trace_start"() <{level = 10 : i32, message = "nqk,nkd->nqd"}> : () -> ()
    %cst_13 = arith.constant dense<0.000000e+00> : vector<8x8x8xf32>
    %66 = tpu.matmul %65, %42, %cst_13 {dimension_numbers = #tpu.dot_dimension_numbers<[2], [1], [1], [2], [0, 0, 0, 1, 1, 2], [0], [0]>} : vector<8x8x8xbf16>, vector<8x8x8xbf16>, vector<8x8x8xf32> -> vector<8x8x8xf32>
    "tpu.trace_stop"() : () -> ()
    %67 = vector.shape_cast %66 : vector<8x8x8xf32> to vector<4x16x8xf32>
    %68 = vector.extract_strided_slice %67 {offsets = [0, 0, 0], sizes = [1, 16, 8], strides = [1, 1, 1]} : vector<4x16x8xf32> to vector<1x16x8xf32>
    %69 = vector.shape_cast %68 : vector<1x16x8xf32> to vector<16x8xf32>
    %70 = vector.extract_strided_slice %67 {offsets = [1, 0, 0], sizes = [1, 16, 8], strides = [1, 1, 1]} : vector<4x16x8xf32> to vector<1x16x8xf32>
    %71 = vector.shape_cast %70 : vector<1x16x8xf32> to vector<16x8xf32>
    %72 = vector.extract_strided_slice %67 {offsets = [2, 0, 0], sizes = [1, 16, 8], strides = [1, 1, 1]} : vector<4x16x8xf32> to vector<1x16x8xf32>
    %73 = vector.shape_cast %72 : vector<1x16x8xf32> to vector<16x8xf32>
    %74 = vector.extract_strided_slice %67 {offsets = [3, 0, 0], sizes = [1, 16, 8], strides = [1, 1, 1]} : vector<4x16x8xf32> to vector<1x16x8xf32>
    %75 = vector.shape_cast %74 : vector<1x16x8xf32> to vector<16x8xf32>
    %76 = tpu.concatenate %69, %71, %73, %75 in 1 : vector<16x8xf32>, vector<16x8xf32>, vector<16x8xf32>, vector<16x8xf32> -> vector<16x32xf32>
    %77 = arith.truncf %76 : vector<16x32xf32> to vector<16x32xbf16>
    %c0_14 = arith.constant 0 : index
    %c0_15 = arith.constant 0 : index
    %c0_16 = arith.constant 0 : index
    %78 = vector.load %arg9[%c0_14, %c0_15, %c0_16] : memref<1x32x32xbf16, #tpu.memory_space<vmem>>, vector<1x32x32xbf16>
    %79 = vector.shape_cast %78 : vector<1x32x32xbf16> to vector<32x32xbf16>
    %cst_17 = arith.constant dense<0.000000e+00> : vector<16x32xf32>
    %80 = tpu.matmul %77, %79, %cst_17 {dimension_numbers = #tpu.dot_dimension_numbers<[1], [0], [0], [1], [0, 0, 1, 1], [], []>} : vector<16x32xbf16>, vector<32x32xbf16>, vector<16x32xf32> -> vector<16x32xf32>
    %c0_18 = arith.constant 0 : index
    %c0_19 = arith.constant 0 : index
    %c0_20 = arith.constant 0 : index
    %81 = vector.load %arg10[%c0_18, %c0_19, %c0_20] : memref<1x1x32xf32, #tpu.memory_space<vmem>>, vector<1x1x32xf32>
    %82 = vector.shape_cast %81 : vector<1x1x32xf32> to vector<1x32xf32>
    %83 = vector.broadcast %82 : vector<1x32xf32> to vector<16x32xf32>
    %84 = arith.addf %80, %83 : vector<16x32xf32>
    %85 = arith.addf %3, %84 : vector<16x32xf32>
    %cst_21 = arith.constant dense<0.000000e+00> : vector<16xf32>
    %86 = vector.multi_reduction <add>, %85, %cst_21 [1] : vector<16x32xf32> to vector<16xf32>
    %87 = vector.shape_cast %86 : vector<16xf32> to vector<16x1xf32>
    %cst_22 = arith.constant 3.200000e+01 : f32
    %88 = vector.broadcast %cst_22 : f32 to vector<16x1xf32>
    %89 = arith.divf %87, %88 : vector<16x1xf32>
    %90 = arith.mulf %85, %85 : vector<16x32xf32>
    %cst_23 = arith.constant dense<0.000000e+00> : vector<16xf32>
    %91 = vector.multi_reduction <add>, %90, %cst_23 [1] : vector<16x32xf32> to vector<16xf32>
    %92 = vector.shape_cast %91 : vector<16xf32> to vector<16x1xf32>
    %cst_24 = arith.constant 3.200000e+01 : f32
    %93 = vector.broadcast %cst_24 : f32 to vector<16x1xf32>
    %94 = arith.divf %92, %93 : vector<16x1xf32>
    %95 = arith.mulf %89, %89 : vector<16x1xf32>
    %96 = arith.subf %94, %95 : vector<16x1xf32>
    %cst_25 = arith.constant 0.000000e+00 : f32
    %97 = vector.broadcast %cst_25 : f32 to vector<16x1xf32>
    %98 = arith.maximumf %96, %97 : vector<16x1xf32>
    %99 = vector.broadcast %89 : vector<16x1xf32> to vector<16x32xf32>
    %100 = arith.subf %85, %99 : vector<16x32xf32>
    %cst_26 = arith.constant 9.99999974E-6 : f32
    %101 = vector.broadcast %cst_26 : f32 to vector<16x1xf32>
    %102 = arith.addf %98, %101 : vector<16x1xf32>
    %103 = math.rsqrt %102 : vector<16x1xf32>
    %104 = vector.broadcast %103 : vector<16x1xf32> to vector<16x32xf32>
    %105 = arith.mulf %100, %104 : vector<16x32xf32>
    %c0_27 = arith.constant 0 : index
    %c0_28 = arith.constant 0 : index
    %c0_29 = arith.constant 0 : index
    %106 = vector.load %arg11[%c0_27, %c0_28, %c0_29] : memref<1x1x32xf32, #tpu.memory_space<vmem>>, vector<1x1x32xf32>
    %107 = vector.shape_cast %106 : vector<1x1x32xf32> to vector<1x32xf32>
    %108 = vector.broadcast %107 : vector<1x32xf32> to vector<16x32xf32>
    %109 = arith.mulf %105, %108 : vector<16x32xf32>
    %c0_30 = arith.constant 0 : index
    %c0_31 = arith.constant 0 : index
    %c0_32 = arith.constant 0 : index
    %110 = vector.load %arg12[%c0_30, %c0_31, %c0_32] : memref<1x1x32xf32, #tpu.memory_space<vmem>>, vector<1x1x32xf32>
    %111 = vector.shape_cast %110 : vector<1x1x32xf32> to vector<1x32xf32>
    %112 = vector.broadcast %111 : vector<1x32xf32> to vector<16x32xf32>
    %113 = arith.addf %109, %112 : vector<16x32xf32>
    %114 = arith.truncf %113 : vector<16x32xf32> to vector<16x32xbf16>
    %c0_33 = arith.constant 0 : index
    %c0_34 = arith.constant 0 : index
    %c0_35 = arith.constant 0 : index
    %115 = vector.load %arg13[%c0_33, %c0_34, %c0_35] : memref<1x32x2048xbf16, #tpu.memory_space<vmem>>, vector<1x32x2048xbf16>
    %116 = vector.shape_cast %115 : vector<1x32x2048xbf16> to vector<32x2048xbf16>
    %cst_36 = arith.constant dense<0.000000e+00> : vector<16x2048xf32>
    %117 = tpu.matmul %114, %116, %cst_36 {dimension_numbers = #tpu.dot_dimension_numbers<[1], [0], [0], [1], [0, 0, 1, 1], [], []>} : vector<16x32xbf16>, vector<32x2048xbf16>, vector<16x2048xf32> -> vector<16x2048xf32>
    %c0_37 = arith.constant 0 : index
    %c0_38 = arith.constant 0 : index
    %c0_39 = arith.constant 0 : index
    %118 = vector.load %arg14[%c0_37, %c0_38, %c0_39] : memref<1x1x2048xf32, #tpu.memory_space<vmem>>, vector<1x1x2048xf32>
    %119 = vector.shape_cast %118 : vector<1x1x2048xf32> to vector<1x2048xf32>
    %120 = vector.broadcast %119 : vector<1x2048xf32> to vector<16x2048xf32>
    %121 = arith.addf %117, %120 : vector<16x2048xf32>
    %cst_40 = arith.constant 0.000000e+00 : f32
    %122 = vector.broadcast %cst_40 : f32 to vector<16x2048xf32>
    %123 = arith.maximumf %121, %122 : vector<16x2048xf32>
    %124 = arith.truncf %123 : vector<16x2048xf32> to vector<16x2048xbf16>
    %c0_41 = arith.constant 0 : index
    %c0_42 = arith.constant 0 : index
    %c0_43 = arith.constant 0 : index
    %125 = vector.load %arg15[%c0_41, %c0_42, %c0_43] : memref<1x2048x32xbf16, #tpu.memory_space<vmem>>, vector<1x2048x32xbf16>
    %126 = vector.shape_cast %125 : vector<1x2048x32xbf16> to vector<2048x32xbf16>
    %cst_44 = arith.constant dense<0.000000e+00> : vector<16x32xf32>
    %127 = tpu.matmul %124, %126, %cst_44 {dimension_numbers = #tpu.dot_dimension_numbers<[1], [0], [0], [1], [0, 0, 1, 1], [], []>} : vector<16x2048xbf16>, vector<2048x32xbf16>, vector<16x32xf32> -> vector<16x32xf32>
    %c0_45 = arith.constant 0 : index
    %c0_46 = arith.constant 0 : index
    %c0_47 = arith.constant 0 : index
    %128 = vector.load %arg16[%c0_45, %c0_46, %c0_47] : memref<1x1x32xf32, #tpu.memory_space<vmem>>, vector<1x1x32xf32>
    %129 = vector.shape_cast %128 : vector<1x1x32xf32> to vector<1x32xf32>
    %130 = vector.broadcast %129 : vector<1x32xf32> to vector<16x32xf32>
    %131 = arith.addf %127, %130 : vector<16x32xf32>
    %132 = arith.addf %113, %131 : vector<16x32xf32>
    %cst_48 = arith.constant dense<0.000000e+00> : vector<16xf32>
    %133 = vector.multi_reduction <add>, %132, %cst_48 [1] : vector<16x32xf32> to vector<16xf32>
    %134 = vector.shape_cast %133 : vector<16xf32> to vector<16x1xf32>
    %cst_49 = arith.constant 3.200000e+01 : f32
    %135 = vector.broadcast %cst_49 : f32 to vector<16x1xf32>
    %136 = arith.divf %134, %135 : vector<16x1xf32>
    %137 = arith.mulf %132, %132 : vector<16x32xf32>
    %cst_50 = arith.constant dense<0.000000e+00> : vector<16xf32>
    %138 = vector.multi_reduction <add>, %137, %cst_50 [1] : vector<16x32xf32> to vector<16xf32>
    %139 = vector.shape_cast %138 : vector<16xf32> to vector<16x1xf32>
    %cst_51 = arith.constant 3.200000e+01 : f32
    %140 = vector.broadcast %cst_51 : f32 to vector<16x1xf32>
    %141 = arith.divf %139, %140 : vector<16x1xf32>
    %142 = arith.mulf %136, %136 : vector<16x1xf32>
    %143 = arith.subf %141, %142 : vector<16x1xf32>
    %cst_52 = arith.constant 0.000000e+00 : f32
    %144 = vector.broadcast %cst_52 : f32 to vector<16x1xf32>
    %145 = arith.maximumf %143, %144 : vector<16x1xf32>
    %146 = vector.broadcast %136 : vector<16x1xf32> to vector<16x32xf32>
    %147 = arith.subf %132, %146 : vector<16x32xf32>
    %cst_53 = arith.constant 9.99999974E-6 : f32
    %148 = vector.broadcast %cst_53 : f32 to vector<16x1xf32>
    %149 = arith.addf %145, %148 : vector<16x1xf32>
    %150 = math.rsqrt %149 : vector<16x1xf32>
    %151 = vector.broadcast %150 : vector<16x1xf32> to vector<16x32xf32>
    %152 = arith.mulf %147, %151 : vector<16x32xf32>
    %c0_54 = arith.constant 0 : index
    %c0_55 = arith.constant 0 : index
    %c0_56 = arith.constant 0 : index
    %153 = vector.load %arg17[%c0_54, %c0_55, %c0_56] : memref<1x1x32xf32, #tpu.memory_space<vmem>>, vector<1x1x32xf32>
    %154 = vector.shape_cast %153 : vector<1x1x32xf32> to vector<1x32xf32>
    %155 = vector.broadcast %154 : vector<1x32xf32> to vector<16x32xf32>
    %156 = arith.mulf %152, %155 : vector<16x32xf32>
    %c0_57 = arith.constant 0 : index
    %c0_58 = arith.constant 0 : index
    %c0_59 = arith.constant 0 : index
    %157 = vector.load %arg18[%c0_57, %c0_58, %c0_59] : memref<1x1x32xf32, #tpu.memory_space<vmem>>, vector<1x1x32xf32>
    %158 = vector.shape_cast %157 : vector<1x1x32xf32> to vector<1x32xf32>
    %159 = vector.broadcast %158 : vector<1x32xf32> to vector<16x32xf32>
    %160 = arith.addf %156, %159 : vector<16x32xf32>
    %c0_60 = arith.constant 0 : index
    %c0_61 = arith.constant 0 : index
    %161 = vector.load %arg21[%c0_60, %c0_61] : memref<16x32xf32, #tpu.memory_space<vmem>>, vector<16x32xf32>
    tpu.vector_store %arg21[%c0_60, %c0_61], %160 {strides = array<i32>} : memref<16x32xf32, #tpu.memory_space<vmem>>, vector<16x32xf32>,
    %c1_i32_62 = arith.constant 1 : i32
    %162 = arith.cmpi eq, %arg1, %c1_i32_62 : i32
    %163 = arith.extui %162 : i1 to i32
    %c0_i32_63 = arith.constant 0 : i32
    %164 = arith.cmpi ne, %163, %c0_i32_63 : i32
    scf.if %164 {
      %c0_64 = arith.constant 0 : index
      %c0_65 = arith.constant 0 : index
      %165 = vector.load %arg4[%c0_64, %c0_65] : memref<2x8xf32, #tpu.memory_space<vmem>>, vector<2x8xf32>
      %166 = vector.shape_cast %160 : vector<16x32xf32> to vector<2x8x32xf32>
      %167 = vector.shape_cast %165 : vector<2x8xf32> to vector<2x8x1xf32>
      %168 = vector.broadcast %167 : vector<2x8x1xf32> to vector<2x8x32xf32>
      %169 = arith.mulf %166, %168 : vector<2x8x32xf32>
      %cst_66 = arith.constant dense<0.000000e+00> : vector<2x32xf32>
      %170 = vector.multi_reduction <add>, %169, %cst_66 [1] : vector<2x8x32xf32> to vector<2x32xf32>
      %cst_67 = arith.constant dense<0.000000e+00> : vector<2xf32>
      %171 = vector.multi_reduction <add>, %165, %cst_67 [1] : vector<2x8xf32> to vector<2xf32>
      %172 = vector.shape_cast %171 : vector<2xf32> to vector<2x1xf32>
      %cst_68 = arith.constant 1.000000e+00 : f32
      %173 = vector.broadcast %cst_68 : f32 to vector<2x1xf32>
      %174 = arith.maximumf %172, %173 : vector<2x1xf32>
      %175 = tpu.reciprocal %174 {approx = true} : vector<2x1xf32> -> vector<2x1xf32>
      %176 = vector.broadcast %175 : vector<2x1xf32> to vector<2x32xf32>
      %177 = arith.mulf %170, %176 : vector<2x32xf32>
      %178 = arith.mulf %177, %177 : vector<2x32xf32>
      %cst_69 = arith.constant dense<0.000000e+00> : vector<2xf32>
      %179 = vector.multi_reduction <add>, %178, %cst_69 [1] : vector<2x32xf32> to vector<2xf32>
      %180 = vector.shape_cast %179 : vector<2xf32> to vector<2x1xf32>
      %cst_70 = arith.constant 1.000000e-24 : f32
      %181 = vector.broadcast %cst_70 : f32 to vector<2x1xf32>
      %182 = arith.maximumf %180, %181 : vector<2x1xf32>
      %183 = math.rsqrt %182 : vector<2x1xf32>
      %184 = vector.broadcast %183 : vector<2x1xf32> to vector<2x32xf32>
      %185 = arith.mulf %177, %184 : vector<2x32xf32>
      %c0_71 = arith.constant 0 : index
      %c0_72 = arith.constant 0 : index
      %186 = vector.load %arg20[%c0_71, %c0_72] : memref<2x32xf32, #tpu.memory_space<vmem>>, vector<2x32xf32>
      tpu.vector_store %arg20[%c0_71, %c0_72], %185 {strides = array<i32>} : memref<2x32xf32, #tpu.memory_space<vmem>>, vector<2x32xf32>,
      %187 = arith.mulf %160, %160 : vector<16x32xf32>
      %cst_73 = arith.constant dense<0.000000e+00> : vector<16xf32>
      %188 = vector.multi_reduction <add>, %187, %cst_73 [1] : vector<16x32xf32> to vector<16xf32>
      %189 = vector.shape_cast %188 : vector<16xf32> to vector<16x1xf32>
      %cst_74 = arith.constant 1.000000e-24 : f32
      %190 = vector.broadcast %cst_74 : f32 to vector<16x1xf32>
      %191 = arith.maximumf %189, %190 : vector<16x1xf32>
      %192 = math.rsqrt %191 : vector<16x1xf32>
      %193 = vector.broadcast %192 : vector<16x1xf32> to vector<16x32xf32>
      %194 = arith.mulf %160, %193 : vector<16x32xf32>
      %195 = vector.shape_cast %194 : vector<16x32xf32> to vector<2x8x32xf32>
      %196 = vector.extract_strided_slice %195 {offsets = [0, 0, 0], sizes = [2, 1, 32], strides = [1, 1, 1]} : vector<2x8x32xf32> to vector<2x1x32xf32>
      %197 = vector.shape_cast %196 : vector<2x1x32xf32> to vector<2x32xf32>
      %198 = vector.extract_strided_slice %195 {offsets = [0, 1, 0], sizes = [2, 1, 32], strides = [1, 1, 1]} : vector<2x8x32xf32> to vector<2x1x32xf32>
      %199 = vector.shape_cast %198 : vector<2x1x32xf32> to vector<2x32xf32>
      %200 = vector.extract_strided_slice %195 {offsets = [0, 2, 0], sizes = [2, 1, 32], strides = [1, 1, 1]} : vector<2x8x32xf32> to vector<2x1x32xf32>
      %201 = vector.shape_cast %200 : vector<2x1x32xf32> to vector<2x32xf32>
      %202 = vector.extract_strided_slice %195 {offsets = [0, 3, 0], sizes = [2, 1, 32], strides = [1, 1, 1]} : vector<2x8x32xf32> to vector<2x1x32xf32>
      %203 = vector.shape_cast %202 : vector<2x1x32xf32> to vector<2x32xf32>
      %204 = vector.extract_strided_slice %195 {offsets = [0, 4, 0], sizes = [2, 1, 32], strides = [1, 1, 1]} : vector<2x8x32xf32> to vector<2x1x32xf32>
      %205 = vector.shape_cast %204 : vector<2x1x32xf32> to vector<2x32xf32>
      %206 = vector.extract_strided_slice %195 {offsets = [0, 5, 0], sizes = [2, 1, 32], strides = [1, 1, 1]} : vector<2x8x32xf32> to vector<2x1x32xf32>
      %207 = vector.shape_cast %206 : vector<2x1x32xf32> to vector<2x32xf32>
      %208 = vector.extract_strided_slice %195 {offsets = [0, 6, 0], sizes = [2, 1, 32], strides = [1, 1, 1]} : vector<2x8x32xf32> to vector<2x1x32xf32>
      %209 = vector.shape_cast %208 : vector<2x1x32xf32> to vector<2x32xf32>
      %210 = vector.extract_strided_slice %195 {offsets = [0, 7, 0], sizes = [2, 1, 32], strides = [1, 1, 1]} : vector<2x8x32xf32> to vector<2x1x32xf32>
      %211 = vector.shape_cast %210 : vector<2x1x32xf32> to vector<2x32xf32>
      %212 = tpu.concatenate %197, %199, %201, %203, %205, %207, %209, %211 in 1 : vector<2x32xf32>, vector<2x32xf32>, vector<2x32xf32>, vector<2x32xf32>, vector<2x32xf32>, vector<2x32xf32>, vector<2x32xf32>, vector<2x32xf32> -> vector<2x256xf32>
      %c0_75 = arith.constant 0 : index
      %c0_76 = arith.constant 0 : index
      %213 = vector.load %arg19[%c0_75, %c0_76] : memref<2x256xf32, #tpu.memory_space<vmem>>, vector<2x256xf32>
      tpu.vector_store %arg19[%c0_75, %c0_76], %212 {strides = array<i32>} : memref<2x256xf32, #tpu.memory_space<vmem>>, vector<2x256xf32>,
    } else {
    }
    return
  }
  func.func @transform_0(%arg0: i32, %arg1: i32) -> (i32, i32) {
    %c0_i32 = arith.constant 0 : i32
    %c0_i32_0 = arith.constant 0 : i32
    return %arg0, %c0_i32 : i32, i32
  }
  func.func @transform_1(%arg0: i32, %arg1: i32) -> (i32, i32) {
    %c0_i32 = arith.constant 0 : i32
    %c0_i32_0 = arith.constant 0 : i32
    return %arg0, %c0_i32 : i32, i32
  }
  func.func @transform_2(%arg0: i32, %arg1: i32) -> (i32, i32) {
    %c0_i32 = arith.constant 0 : i32
    %c0_i32_0 = arith.constant 0 : i32
    return %arg0, %c0_i32 : i32, i32
  }
  func.func @transform_3(%arg0: i32, %arg1: i32) -> (i32, i32) {
    %c0_i32 = arith.constant 0 : i32
    %c0_i32_0 = arith.constant 0 : i32
    %c0_i32_1 = arith.constant 0 : i32
    return %c0_i32, %c0_i32_0 : i32, i32
  }
  func.func @transform_4(%arg0: i32, %arg1: i32) -> (i32, i32) {
    %c0_i32 = arith.constant 0 : i32
    %c0_i32_0 = arith.constant 0 : i32
    %c0_i32_1 = arith.constant 0 : i32
    return %c0_i32, %c0_i32_0 : i32, i32
  }
  func.func @transform_5(%arg0: i32, %arg1: i32) -> (i32, i32, i32) {
    %c0_i32 = arith.constant 0 : i32
    %c0_i32_0 = arith.constant 0 : i32
    %c0_i32_1 = arith.constant 0 : i32
    return %arg1, %c0_i32, %c0_i32_0 : i32, i32, i32
  }
  func.func @transform_6(%arg0: i32, %arg1: i32) -> (i32, i32, i32) {
    %c0_i32 = arith.constant 0 : i32
    %c0_i32_0 = arith.constant 0 : i32
    %c0_i32_1 = arith.constant 0 : i32
    return %arg1, %c0_i32, %c0_i32_0 : i32, i32, i32
  }
  func.func @transform_7(%arg0: i32, %arg1: i32) -> (i32, i32, i32) {
    %c0_i32 = arith.constant 0 : i32
    %c0_i32_0 = arith.constant 0 : i32
    %c0_i32_1 = arith.constant 0 : i32
    return %arg1, %c0_i32, %c0_i32_0 : i32, i32, i32
  }
  func.func @transform_8(%arg0: i32, %arg1: i32) -> (i32, i32, i32) {
    %c0_i32 = arith.constant 0 : i32
    %c0_i32_0 = arith.constant 0 : i32
    %c0_i32_1 = arith.constant 0 : i32
    return %arg1, %c0_i32, %c0_i32_0 : i32, i32, i32
  }
  func.func @transform_9(%arg0: i32, %arg1: i32) -> (i32, i32, i32) {
    %c0_i32 = arith.constant 0 : i32
    %c0_i32_0 = arith.constant 0 : i32
    %c0_i32_1 = arith.constant 0 : i32
    return %arg1, %c0_i32, %c0_i32_0 : i32, i32, i32
  }
  func.func @transform_10(%arg0: i32, %arg1: i32) -> (i32, i32, i32) {
    %c0_i32 = arith.constant 0 : i32
    %c0_i32_0 = arith.constant 0 : i32
    %c0_i32_1 = arith.constant 0 : i32
    return %arg1, %c0_i32, %c0_i32_0 : i32, i32, i32
  }
  func.func @transform_11(%arg0: i32, %arg1: i32) -> (i32, i32, i32) {
    %c0_i32 = arith.constant 0 : i32
    %c0_i32_0 = arith.constant 0 : i32
    %c0_i32_1 = arith.constant 0 : i32
    return %arg1, %c0_i32, %c0_i32_0 : i32, i32, i32
  }
  func.func @transform_12(%arg0: i32, %arg1: i32) -> (i32, i32, i32) {
    %c0_i32 = arith.constant 0 : i32
    %c0_i32_0 = arith.constant 0 : i32
    %c0_i32_1 = arith.constant 0 : i32
    return %arg1, %c0_i32, %c0_i32_0 : i32, i32, i32
  }
  func.func @transform_13(%arg0: i32, %arg1: i32) -> (i32, i32, i32) {
    %c0_i32 = arith.constant 0 : i32
    %c0_i32_0 = arith.constant 0 : i32
    %c0_i32_1 = arith.constant 0 : i32
    return %arg1, %c0_i32, %c0_i32_0 : i32, i32, i32
  }
  func.func @transform_14(%arg0: i32, %arg1: i32) -> (i32, i32, i32) {
    %c0_i32 = arith.constant 0 : i32
    %c0_i32_0 = arith.constant 0 : i32
    %c0_i32_1 = arith.constant 0 : i32
    return %arg1, %c0_i32, %c0_i32_0 : i32, i32, i32
  }
  func.func @transform_15(%arg0: i32, %arg1: i32) -> (i32, i32, i32) {
    %c0_i32 = arith.constant 0 : i32
    %c0_i32_0 = arith.constant 0 : i32
    %c0_i32_1 = arith.constant 0 : i32
    return %arg1, %c0_i32, %c0_i32_0 : i32, i32, i32
  }
  func.func @transform_16(%arg0: i32, %arg1: i32) -> (i32, i32, i32) {
    %c0_i32 = arith.constant 0 : i32
    %c0_i32_0 = arith.constant 0 : i32
    %c0_i32_1 = arith.constant 0 : i32
    return %arg1, %c0_i32, %c0_i32_0 : i32, i32, i32
  }
  func.func @transform_17(%arg0: i32, %arg1: i32) -> (i32, i32) {
    %c0_i32 = arith.constant 0 : i32
    %c0_i32_0 = arith.constant 0 : i32
    return %arg0, %c0_i32 : i32, i32
  }
  func.func @transform_18(%arg0: i32, %arg1: i32) -> (i32, i32) {
    %c0_i32 = arith.constant 0 : i32
    %c0_i32_0 = arith.constant 0 : i32
    return %arg0, %c0_i32 : i32, i32
  }
}

</mosaic_0001>

<bundles_post_ra>
// kernel: tpu_custom_call.1
= control target key start
LH: loop header
LB: loop body
LE: loop exit
PB: predicated region body
PF: predicated region fallthrough
CT: control target
= control target key end

     0   :  { %s6369_s0 = inlined_call_operand.vmem [shape: f32[16,128], index: 0, kind: input, shape index: {}]   ;;  %s6370_s1 = inlined_call_operand.vmem [shape: f32[2,8], index: 1, kind: input, shape index: {}]   ;;  %s6371_s2 = inlined_call_operand.vmem [shape: f32[2,8], index: 2, kind: input, shape index: {}]   ;;  %s6372_s3 = inlined_call_operand.vmem [shape: bf16[128,32], index: 3, kind: input, shape index: {}]   ;;  %s6373_s4 = inlined_call_operand.vmem [shape: f32[1,32], index: 4, kind: input, shape index: {}]   ;;  %s6374_s5 = inlined_call_operand.vmem [shape: bf16[2,32,96], index: 5, kind: input, shape index: {}]   ;;  %s6375_s6 = inlined_call_operand.vmem [shape: f32[2,1,96], index: 6, kind: input, shape index: {}]   ;;  %s6376_s7 = inlined_call_operand.vmem [shape: bf16[2,32,32], index: 7, kind: input, shape index: {}]   ;;  %s6377_s8 = inlined_call_operand.vmem [shape: f32[2,1,32], index: 8, kind: input, shape index: {}]   ;;  %s6378_s9 = inlined_call_operand.vmem [shape: f32[2,1,32], index: 9, kind: input, shape index: {}]   ;;  %s6379_s10 = inlined_call_operand.vmem [shape: f32[2,1,32], index: 10, kind: input, shape index: {}]   ;;  %s6380_s11 = inlined_call_operand.vmem [shape: bf16[2,32,2048], index: 11, kind: input, shape index: {}]   ;;  %s6381_s12 = inlined_call_operand.vmem [shape: f32[2,1,2048], index: 12, kind: input, shape index: {}]   ;;  %s6382_s13 = inlined_call_operand.vmem [shape: bf16[2,2048,32], index: 13, kind: input, shape index: {}]   ;;  %s6383_s14 = inlined_call_operand.vmem [shape: f32[2,1,32], index: 14, kind: input, shape index: {}]   ;;  %s6384_s15 = inlined_call_operand.vmem [shape: f32[2,1,32], index: 15, kind: input, shape index: {}]   ;;  %s6385_s16 = inlined_call_operand.vmem [shape: f32[2,1,32], index: 16, kind: input, shape index: {}]   ;;  %s6386_s17 = inlined_call_operand.hbm [shape: f32[2,256], index: 17, kind: output, shape index: {0}]   ;;  %s6387_s18 = inlined_call_operand.hbm [shape: f32[2,32], index: 18, kind: output, shape index: {1}]  }
   0x1   :  { %6393 = sst [smem:[#allocation12_spill]] %s6369_s0 }
   0x2   :  { %6394 = sst [smem:[#allocation13_spill]] %s6370_s1 }
   0x3   :  { %6395 = sst [smem:[#allocation14_spill]] %s6371_s2 }
   0x4   :  { %6396 = sst [smem:[#allocation15_spill]] %s6373_s4 }
   0x5   :  { %6397 = sst [smem:[#allocation16_spill]] %s6374_s5 }
   0x6   :  { %6398 = sst [smem:[#allocation17_spill]] %s6375_s6 }
   0x7   :  { %6399 = sst [smem:[#allocation18_spill]] %s6376_s7 }
   0x8   :  { %6400 = sst [smem:[#allocation19_spill]] %s6386_s17 }
   0x9   :  { %6401 = sst [smem:[#allocation20_spill]] %s6387_s18 }
   0xa   :  { %24 = vsyncpa [#allocation4], 0 }
   0xb   :  { %25 = vsyncpa [#allocation6], 0  ;;  %s5634_s27 = smov 0   ;;  %s5636_s28 = smov 0  }
   0xc   :  { %s5638_s29 = smov 0  }
   0xd LB: > { %6402 = sst [smem:[#allocation9_spill]] %s5514_s28  ;;  %s40_s0 = sadd.s32 1, %s5514_s28  ;;  %s5518_s29 = sphi %s5638_s29, %s31_s29   ;;  %s5514_s28 = sphi %s5636_s28, %s6427_s28   ;;  %s5510_s27 = sphi %s5634_s27, %s6426_s27  }
   0xe   : > { %6403 = sst [smem:[#allocation10_spill]] %s5518_s29  ;;  %p41_p0 = scmp.ge.s32.totalorder %s40_s0, 2 }
   0xf   : > { %p4582_p1 = scmp.ge.s32.totalorder %s5518_s29, 1  ;;  %p653_p2 = scmp.lt.s32.totalorder %s5518_s29, 3 }
  0x10   : > { %s6429_s0 = smov (%p41_p0, %s40_s0), 0 }
  0x11   : > { %6404 = sst [smem:[#allocation11_spill]] %s6429_s0  ;;  %p654_p3 = pnand %p4582_p1, %p653_p2 }
  0x12   : > { %p769_p4 = scmp.lt.s32.totalorder (!%p654_p3), %s5510_s27, 1  ;;  %s6406_s5 = sld [smem:[#allocation16_spill]] (!%p654_p3) }
  0x13   : > { %657 = sbr.rel (%p654_p3) target bundleno = 3212 (0xc8c), region = 88  ;;  %s6407_s7 = sld [smem:[#allocation18_spill]] (!%p654_p3) }
  0x14   : > { %p4592_p5 = scmp.ne.s32.totalorder (!%p654_p3), %s5510_s27, 0 }
  0x1a   : > { %s5659_s19 = scalar_select %p769_p4, %s5510_s27, 1 }
  0x1b   : > { %818 = sbr.rel (%p4592_p5) target bundleno = 277 (0x115), region = 92  ;;  %v5231_v0 = vld [vmem:[%s6372_s3] sm:$0xff] (!%p4592_p5)   ;;  %v5520_v1 = vmov (!%p4592_p5), 0.0   ;;  %v5232_v2 = vld [vmem:[%s6372_s3 + $0x8] sm:$0xff] (!%p4592_p5)   ;;  %vm5521_vm0 = vmmov (!%p4592_p5), 0   ;;  %v5233_v3 = vld [vmem:[%s6372_s3 + $0x10] sm:$0xff] (!%p4592_p5)  }
  0x1c   : > { %s4815_s1 = sshll.u32 %s5659_s19, 4  ;;  %s4817_s2 = sshll.u32 %s5659_s19, 8  ;;  %5044 = vmatprep.subr.bf16.mxu0 (!%p4592_p5), %v5520_v1  ;;  %5060 = vmatprep.mubr.msk.bf16.mxu0 (!%p4592_p5), %vm5521_vm0, %v5520_v1  ;;  %v5234_v4 = vld [vmem:[%s6372_s3 + $0x18] sm:$0xff] (!%p4592_p5)   ;;  %v5235_v5 = vld [vmem:[%s6372_s3 + $0x20] sm:$0xff] (!%p4592_p5)   ;;  %v5236_v6 = vld [vmem:[%s6372_s3 + $0x28] sm:$0xff] (!%p4592_p5)   ;;  %vm934_vm1 = vcmask (!%p4592_p5), 261120  }
  0x1d   : > { %s5669_s24 = scalar_lea.vmem %s6406_s5, %s4815_s1  ;;  %s5674_s30 = scalar_lea.vmem %s6407_s7, %s4815_s1  ;;  %5045 = vmatpush3.bf16.msra.mxu0 (!%p4592_p5), %v5231_v0  ;;  %v5237_v7 = vld [vmem:[%s6372_s3 + $0x30] sm:$0xff] (!%p4592_p5)   ;;  %v5238_v8 = vld [vmem:[%s6372_s3 + $0x38] sm:$0xff] (!%p4592_p5)  }
  0x1e   : > { %s5692_s6 = scalar_lea.vmem %s6380_s11, %s4817_s2  ;;  %s5697_s7 = scalar_lea.vmem %s6381_s12, %s4815_s1  ;;  %5046 = vmatprep.subr.bf16.mxu0 (!%p4592_p5), %v5520_v1 }
  0x1f   : > { %s4818_s28 = sshll.u32 %s5659_s19, 10  ;;  %s807_s17 = scalar_lea.vmem %s6383_s14, %s5659_s19 }
  0x20   : > { %s5707_s20 = scalar_lea.vmem %s6382_s13, %s4818_s28  ;;  %s810_s5 = scalar_lea.vmem %s6384_s15, %s5659_s19 }
  0x21   : > { %5047 = vmatpush3.bf16.msra.mxu0 (!%p4592_p5), %v5232_v2  ;;  %s6408_s29 = sld [smem:[#allocation12_spill]] (!%p4592_p5)  ;;  %s6410_s26 = sld [smem:[#allocation15_spill]] (!%p4592_p5) }
  0x22   : > { %5048 = vmatprep.subr.bf16.mxu0 %v5520_v1 }
  0x25   : > { %5049 = vmatpush3.bf16.msra.mxu0 %v5233_v3 }
  0x26   : > { %5050 = vmatprep.subr.bf16.mxu0 %v5520_v1 }
  0x27   : > { %s6409_s21 = smov %s6408_s29  ;;  %v819_v9 = vld [vmem:[%s6408_s29] sm:$0xff] }
  0x28   : > { %v820_v10 = vld [vmem:[%s6409_s21 + $0x8] sm:$0xff]  ;;  %v4593_v12 = vld [vmem:[%s6410_s26] ss:$0 sm:$0xff] }
  0x29   : > { %5051 = vmatpush3.bf16.msra.mxu0 %v5234_v4  ;;  %v821_v11 = vpack.c.bf16 %v820_v10, %v819_v9 }
  0x2a   : > { %5052 = vmatprep.subr.bf16.mxu0 %v5520_v1 }
  0x2d   : > { %5053 = vmatpush3.bf16.msra.mxu0 %v5235_v5 }
  0x2e   : > { %5054 = vmatprep.subr.bf16.mxu0 %v5520_v1 }
  0x31   : > { %5055 = vmatpush3.bf16.msra.mxu0 %v5236_v6 }
  0x32   : > { %5056 = vmatprep.subr.bf16.mxu0 %v5520_v1 }
  0x35   : > { %5057 = vmatpush3.bf16.msra.mxu0 %v5237_v7 }
  0x36   : > { %5058 = vmatprep.subr.bf16.mxu0 %v5520_v1 }
  0x39   : > { %5059 = vmatpush3.bf16.msra.mxu0 %v5238_v8 }
  0x3c   : > { %5061 = vmatmul.mubr.bf16.vlgmr.msra.gmra.mrb[0].mxu0 %v821_v11 }
 0x10f   : > { %v927_v13 = vpop.f32.mrb[0].mxu0 }
 0x110   : > { %v928_v14 = vadd.f32 %v4593_v12, %v927_v13  ;;  %v5062_v15 = vpop.f32.mrb[1].mxu0 }
 0x111   : > { %v930_v16 = vpop.f32.mrb[2].mxu0 }
 0x112   : > { %935 = vst.msk [vmem:[#allocation2] sm:$0xff] %vm934_vm1, %v928_v14  ;;  %v931_v17 = vadd.f32 %v4593_v12, %v930_v16  ;;  %v5063_v18 = vpop.f32.mrb[3].mxu0 }
 0x114   : > { %936 = vst.msk [vmem:[#allocation2 + $0x8] sm:$0xff] %vm934_vm1, %v931_v17 }
 0x115 PF: > { %v5254_v19 = vld [vmem:[%s5669_s24] sm:$0xff]   ;;  %v5522_v20 = vmov 0.0   ;;  %v5255_v21 = vld [vmem:[%s5669_s24 + $0x8] sm:$0xff]   ;;  %vm5523_vm2 = vmmov 0   ;;  %vm963_vm3 = vcmask 261120   ;;  %s6411_s4 = sld [smem:[#allocation17_spill]]  ;;  %v1427_v2 = vlaneseq  ;;  %s6416_s24 = scalar_lea.vmem %s6379_s10, %s5659_s19 }
 0x116   : > { %5064 = vmatprep.subr.bf16.mxu0 %v5522_v20  ;;  %5072 = vmatprep.subr.bf16.mxu1 %v5522_v20  ;;  %s5524_s22 = smov 104   ;;  %s5525_s28 = smov 120   ;;  %vm1034_vm4 = vcmask 64512   ;;  %vm1565_vm5 = vcmask 1043456   ;;  %v5529_v0 = vmov 1966171168  }
 0x117   : > { %5065 = vmatpush3.bf16.msra.mxu0 %v5254_v19  ;;  %5068 = vmatprep.mubr.msk.bf16.mxu0 %vm5523_vm2, %v5522_v20  ;;  %s5526_s0 = smov 96   ;;  %s5527_s29 = smov 112   ;;  %v1425_v1 = vunpack.c.l.s4 %v5529_v0  ;;  %v5841_v4 = vshrl.u32 %v1427_v2, 7  ;;  %vm1971_vm6 = vcmask 130048   ;;  %vm1974_vm7 = vcmask 195584  }
 0x118   : > { %5066 = vmatprep.subr.bf16.mxu0 %v5522_v20  ;;  %5074 = vmatprep.mubr.msk.bf16.mxu1 %vm5523_vm2, %v5522_v20  ;;  %s5528_s2 = smov 64   ;;  %s6413_s25 = sld [smem:[#allocation13_spill]] }
 0x119   : > { %v937_v22 = vld [vmem:[#allocation2] sm:$0xff]  ;;  %s1418_s23 = scalar_select %p769_p4, 1, 0  ;;  %v1426_v3 = vunpack.c.0.s8 %v1425_v1  ;;  %v5848_v11 = vsub.s32 0, %v5841_v4 }
 0x11a   : > { %p4807_p6 = scmp.ne.s32.totalorder %s5510_s27, 1 }
 0x11b   : > { %v938_v23 = vld [vmem:[#allocation2 + $0x8] sm:$0xff]  ;;  %5067 = vmatpush3.bf16.msra.mxu0 %v5255_v21  ;;  %s6412_s18 = scalar_lea.vmem %s6411_s4, %s5659_s19  ;;  %s1419_s1 = scvt.s32.f32 %s1418_s23  ;;  %v1429_v8 = vsub.s32 %v1426_v3, %v5841_v4  ;;  %vm4218_vm8 = vcmask (!%p4807_p6), 58368   ;;  %vm4235_vm9 = vcmask (!%p4807_p6), 1041409   ;;  %vm4238_vm10 = vcmask (!%p4807_p6), 254976  }
 0x11c   : > { %v939_v24 = vpack.c.bf16 %v938_v23, %v937_v22  ;;  %5078 = vmatprep.subr.bf16.mxu0 %v5522_v20  ;;  %v4602_v25 = vld [vmem:[%s6412_s18] ss:$0 sm:$0xff]  ;;  %s5530_s4 = smov 8   ;;  %s5531_s18 = smov 16   ;;  %vm4315_vm11 = vcmask (!%p4807_p6), 523264   ;;  %vm4317_vm12 = vcmask (!%p4807_p6), 785408  }
 0x11d   : > { %v1421_v6 = vstv %s1419_s1  ;;  %s6415_s23 = scalar_lea.vmem %s6378_s9, %s5659_s19  ;;  %s5534_s27 = smov (!%p4807_p6), 32  }
 0x11e   : > { %5069 = vmatmul.mubr.msk.bf16.vlgmr.msra.gmra.mrb[0].mxu0 %vm963_vm3, %v939_v24  ;;  %v1420_v5 = vld [vmem:[%s6413_s25] sm:$0x3] }
 0x11f   : > { %5080 = vmatprep.mubr.msk.bf16.mxu0 %vm5523_vm2, %v5522_v20  ;;  %v1422_v7 = vmul.f32 %v1421_v6, %v1420_v5 }
 0x121   : > { %v1430_v9 = vrot.slane %v1422_v7, %v1429_v8 }
 0x123   : > { %v1438_v10 = vrot.slane %v1430_v9, %v1429_v8  ;;  %v1431_v12 = vcombine.high %v1430_v9, %v1430_v9 }
 0x125   : > { %v1449_v13 = vrot.slane %v1438_v10, %v5848_v11  ;;  %v1445_v14 = vrot.slane %v1431_v12, %v1429_v8 }
 0x127   : > { %v1453_v18 = vrot.slane %v1445_v14, %v5848_v11 }
 0x1f1   : > { %v1001_v26 = vpop.f32.mrb[0].mxu0 }
 0x1f2   : > { %v5070_v27 = vpop.f32.mrb[1].mxu0  ;;  %v1002_v29 = vadd.f32 %v4602_v25, %v1001_v26 }
 0x1f3   : > { %v1004_v28 = vpop.f32.mrb[2].mxu0 }
 0x1f4   : > { %v1005_v30 = vadd.f32 %v4602_v25, %v1004_v28  ;;  %v5071_v31 = vpop.f32.mrb[3].mxu0  ;;  %v4819_v33 = vpack.c.bf16 %v1002_v29, %v1002_v29 }
 0x1f6   : > { %v1008_v32 = vpack.c.bf16 %v1005_v30, %v1002_v29  ;;  %v4820_v34 = vpack.c.bf16 %v1005_v30, %v1005_v30 }
 0x1f8   : > { %1014 = vrot.lane.b32.xlu1 %v1008_v32, %s5524_s22  ;;  %1010 = vrot.lane.b32.xlu0 %v1008_v32, %s5525_s28  ;;  %s5532_s22 = smov 24   ;;  %s5536_s28 = smov (!%p4807_p6), 96  }
 0x1fc   : > { %1032 = vrot.lane.b32.xlu1 %v4819_v33, %s5526_s0  ;;  %1012 = vrot.lane.b32.xlu0 %v1008_v32, %s5527_s29 }
 0x200   : > { %1081 = vrot.lane.b32.xlu0 %v4820_v34, %s5526_s0 }
 0x26a   : > { %v1015_v35 = vpop.permute.xlu1 %1014  ;;  %v1011_v36 = vpop.permute.xlu0 %1010 }
 0x26b   : > { %v5769_v37 = vcombine.low %v1011_v36, %v1011_v36  ;;  %v5771_v38 = vcombine.high %v1011_v36, %v1011_v36  ;;  %v5783_v45 = vcombine.low %v1015_v35, %v1015_v35  ;;  %v5785_v46 = vcombine.high %v1015_v35, %v1015_v35 }
 0x26d   : > { %1177 = vrot.lane.b32.xlu0 %v5771_v38, %s5526_s0  ;;  %1129 = vrot.lane.b32.xlu1 %v5769_v37, %s5526_s0 }
 0x26e   : > { %v1033_v39 = vpop.permute.xlu1 %1032  ;;  %v1013_v40 = vpop.permute.xlu0 %1012 }
 0x26f   : > { %v5775_v41 = vcombine.low %v1013_v40, %v1013_v40  ;;  %v5777_v42 = vcombine.high %v1013_v40, %v1013_v40  ;;  %v1039_v43 = vsel %vm1034_vm4, %v1033_v39, 0 }
 0x270   : > { %5073 = vmatpush3.bf16.xpose.msra.mxu1 %v1039_v43 }
 0x271   : > { %1273 = vrot.lane.b32.xlu0 %v5777_v42, %s5526_s0  ;;  %1225 = vrot.lane.b32.xlu1 %v5775_v41, %s5526_s0 }
 0x272   : > { %v1082_v44 = vpop.permute.xlu0 %1081  ;;  %5084 = vmatprep.subr.bf16.mxu1 %v5522_v20 }
 0x273   : > { %v1087_v47 = vsel %vm1034_vm4, %v1082_v44, 0 }
 0x274   : > { %5079 = vmatpush3.bf16.xpose.msra.mxu0 %v1087_v47 }
 0x275   : > { %1369 = vrot.lane.b32.xlu0 %v5785_v46, %s5526_s0  ;;  %1321 = vrot.lane.b32.xlu1 %v5783_v45, %s5526_s0  ;;  %s6414_s0 = scalar_lea.vmem %s6377_s8, %s5659_s19 }
 0x276   : > { %5090 = vmatprep.subr.bf16.mxu0 %v5522_v20 }
 0x277   : > { %5075 = vmatmul.mubr.msk.bf16.vlgmr.msra.gmra.mrb[0].mxu1 %vm1034_vm4, %v4819_v33 }
 0x278   : > { %5086 = vmatprep.mubr.msk.bf16.mxu1 %vm5523_vm2, %v5522_v20 }
 0x279   : > { %1560 = vrot.lane.b32.xlu0 %v4819_v33, %s5528_s2  ;;  %1609 = vrot.lane.b32.xlu1 %v4820_v34, %s5528_s2 }
 0x27b   : > { %5081 = vmatmul.mubr.msk.bf16.vlgmr.msra.gmra.mrb[4].mxu0 %vm1034_vm4, %v4820_v34 }
 0x27c   : > { %5092 = vmatprep.mubr.msk.bf16.mxu0 %vm5523_vm2, %v5522_v20 }
 0x2df   : > { %v1130_v48 = vpop.permute.xlu1 %1129  ;;  %v1178_v49 = vpop.permute.xlu0 %1177 }
 0x2e0   : > { %v1135_v50 = vsel %vm1034_vm4, %v1130_v48, 0  ;;  %v1183_v51 = vsel %vm1034_vm4, %v1178_v49, 0 }
 0x2e1   : > { %5085 = vmatpush3.bf16.xpose.msra.mxu1 %v1135_v50  ;;  %5091 = vmatpush3.bf16.xpose.msra.mxu0 %v1183_v51 }
 0x2e2   : > { %5096 = vmatprep.subr.bf16.mxu1 %v5522_v20  ;;  %5102 = vmatprep.subr.bf16.mxu0 %v5522_v20 }
 0x2e3   : > { %v1226_v52 = vpop.permute.xlu1 %1225  ;;  %v1274_v53 = vpop.permute.xlu0 %1273 }
 0x2e4   : > { %v1231_v54 = vsel %vm1034_vm4, %v1226_v52, 0  ;;  %v1279_v55 = vsel %vm1034_vm4, %v1274_v53, 0 }
 0x2e7   : > { %v1322_v56 = vpop.permute.xlu1 %1321  ;;  %v1370_v57 = vpop.permute.xlu0 %1369 }
 0x2e8   : > { %5087 = vmatmul.mubr.msk.bf16.vlgmr.msra.gmra.mrb[4].mxu1 %vm1034_vm4, %v5769_v37  ;;  %5093 = vmatmul.mubr.msk.bf16.vlgmr.msra.gmra.mrb[8].mxu0 %vm1034_vm4, %v5771_v38  ;;  %v1327_v58 = vsel %vm1034_vm4, %v1322_v56, 0  ;;  %v1375_v59 = vsel %vm1034_vm4, %v1370_v57, 0 }
 0x2e9   : > { %5097 = vmatpush3.bf16.xpose.msra.mxu1 %v1231_v54  ;;  %5103 = vmatpush3.bf16.xpose.msra.mxu0 %v1279_v55 }
 0x2ea   : > { %5098 = vmatprep.mubr.msk.bf16.mxu1 %vm5523_vm2, %v5522_v20  ;;  %5104 = vmatprep.mubr.msk.bf16.mxu0 %vm5523_vm2, %v5522_v20 }
 0x2eb   : > { %5108 = vmatprep.subr.bf16.mxu1 %v5522_v20  ;;  %5114 = vmatprep.subr.bf16.mxu0 %v5522_v20  ;;  %v1610_v60 = vpop.permute.xlu1 %1609  ;;  %v1561_v61 = vpop.permute.xlu0 %1560 }
 0x2ec   : > { %v1615_v62 = vsel %vm1565_vm5, %v1610_v60, 0  ;;  %v1567_v63 = vsel %vm1565_vm5, %v1561_v61, 0 }
 0x2f0   : > { %5099 = vmatmul.mubr.msk.bf16.vlgmr.msra.gmra.mrb[8].mxu1 %vm1034_vm4, %v5775_v41  ;;  %5105 = vmatmul.mubr.msk.bf16.vlgmr.msra.gmra.mrb[12].mxu0 %vm1034_vm4, %v5777_v42 }
 0x2f1   : > { %5109 = vmatpush3.bf16.xpose.msra.mxu1 %v1327_v58  ;;  %5115 = vmatpush3.bf16.xpose.msra.mxu0 %v1375_v59 }
 0x2f2   : > { %5110 = vmatprep.mubr.msk.bf16.mxu1 %vm5523_vm2, %v5522_v20  ;;  %5116 = vmatprep.mubr.msk.bf16.mxu0 %vm5523_vm2, %v5522_v20 }
 0x2f3   : > { %5120 = vmatprep.subr.bf16.mxu1 %v5522_v20  ;;  %5126 = vmatprep.subr.bf16.mxu0 %v5522_v20 }
 0x2f8   : > { %5111 = vmatmul.mubr.msk.bf16.vlgmr.msra.gmra.mrb[12].mxu1 %vm1034_vm4, %v5783_v45  ;;  %5117 = vmatmul.mubr.msk.bf16.vlgmr.msra.gmra.mrb[16].mxu0 %vm1034_vm4, %v5785_v46 }
 0x2f9   : > { %5121 = vmatpush3.bf16.msra.mxu1 %v1567_v63  ;;  %5127 = vmatpush3.bf16.msra.mxu0 %v1615_v62 }
 0x2fa   : > { %5122 = vmatprep.mubr.msk.bf16.mxu1 %vm5523_vm2, %v5522_v20  ;;  %5128 = vmatprep.mubr.msk.bf16.mxu0 %vm5523_vm2, %v5522_v20 }
 0x2fb   : > { %5132 = vmatprep.subr.bf16.mxu1 %v5522_v20  ;;  %5138 = vmatprep.subr.bf16.mxu0 %v5522_v20 }
 0x34a   : > { %v1075_v15 = vpop.f32.mrb[0].mxu1 }
 0x34b   : > { %v1456_v16 = vadd.f32 %v1449_v13, %v1075_v15  ;;  %v5076_v17 = vpop.f32.mrb[1].mxu1 }
 0x34c   : > { %v1078_v19 = vpop.f32.mrb[2].mxu1 }
 0x34d   : > { %v5077_v21 = vpop.f32.mrb[3].mxu1  ;;  %v1464_v22 = vsel %vm1034_vm4, %v1456_v16, -inf }
 0x34e   : > { %1465 = vmax.xlane.f32.xlu1 %v1464_v22  ;;  %v1123_v23 = vpop.f32.mrb[4].mxu0 }
 0x34f   : > { %v1457_v24 = vadd.f32 %v1453_v18, %v1123_v23  ;;  %v5082_v25 = vpop.f32.mrb[5].mxu0 }
 0x350   : > { %v1126_v26 = vpop.f32.mrb[6].mxu0 }
 0x351   : > { %v5083_v27 = vpop.f32.mrb[7].mxu0  ;;  %v1467_v28 = vsel %vm1034_vm4, %v1457_v24, -inf }
 0x352   : > { %1468 = vmax.xlane.f32.xlu0 %v1467_v28 }
 0x3bb   : > { %v1171_v29 = vpop.f32.mrb[4].mxu1  ;;  %v1219_v30 = vpop.f32.mrb[8].mxu0 }
 0x3bc   : > { %v1458_v31 = vadd.f32 %v1449_v13, %v1171_v29  ;;  %v1459_v32 = vadd.f32 %v1453_v18, %v1219_v30  ;;  %v5088_v33 = vpop.f32.mrb[5].mxu1  ;;  %v5094_v34 = vpop.f32.mrb[9].mxu0 }
 0x3bd   : > { %v1174_v35 = vpop.f32.mrb[6].mxu1  ;;  %v1222_v36 = vpop.f32.mrb[10].mxu0 }
 0x3be   : > { %v5089_v39 = vpop.f32.mrb[7].mxu1  ;;  %v5095_v40 = vpop.f32.mrb[11].mxu0  ;;  %v1470_v43 = vsel %vm1034_vm4, %v1458_v31, -inf  ;;  %v1473_v44 = vsel %vm1034_vm4, %v1459_v32, -inf }
 0x3bf   : > { %1471 = vmax.xlane.f32.xlu0 %v1470_v43  ;;  %1474 = vmax.xlane.f32.xlu1 %v1473_v44 }
 0x3c3   : > { %v1267_v47 = vpop.f32.mrb[8].mxu1  ;;  %v1315_v48 = vpop.f32.mrb[12].mxu0 }
 0x3c4   : > { %v5856_v49 = vadd.f32 %v1449_v13, %v1267_v47  ;;  %v1461_v50 = vadd.f32 %v1453_v18, %v1315_v48  ;;  %v5100_v51 = vpop.f32.mrb[9].mxu1  ;;  %v5106_v52 = vpop.f32.mrb[13].mxu0 }
 0x3c5   : > { %v1270_v53 = vpop.f32.mrb[10].mxu1  ;;  %v1318_v54 = vpop.f32.mrb[14].mxu0 }
 0x3c6   : > { %v5101_v55 = vpop.f32.mrb[11].mxu1  ;;  %v5107_v56 = vpop.f32.mrb[15].mxu0  ;;  %v1476_v57 = vsel %vm1034_vm4, %v5856_v49, -inf  ;;  %v1479_v58 = vsel %vm1034_vm4, %v1461_v50, -inf }
 0x3c7   : > { %1477 = vmax.xlane.f32.xlu0 %v1476_v57  ;;  %1480 = vmax.xlane.f32.xlu1 %v1479_v58 }
 0x3cb   : > { %v1363_v59 = vpop.f32.mrb[12].mxu1  ;;  %v1411_v60 = vpop.f32.mrb[16].mxu0 }
 0x3cc   : > { %v5861_v61 = vadd.f32 %v1449_v13, %v1363_v59  ;;  %v1463_v62 = vadd.f32 %v1453_v18, %v1411_v60  ;;  %v5112_v63 = vpop.f32.mrb[13].mxu1  ;;  %v5118_v0 = vpop.f32.mrb[17].mxu0 }
 0x3cd   : > { %v1366_v1 = vpop.f32.mrb[14].mxu1  ;;  %v1414_v2 = vpop.f32.mrb[18].mxu0 }
 0x3ce   : > { %v5113_v3 = vpop.f32.mrb[15].mxu1  ;;  %v5119_v5 = vpop.f32.mrb[19].mxu0  ;;  %v1482_v6 = vsel %vm1034_vm4, %v5861_v61, -inf  ;;  %v1485_v7 = vsel %vm1034_vm4, %v1463_v62, -inf }
 0x3cf   : > { %1483 = vmax.xlane.f32.xlu0 %v1482_v6  ;;  %1486 = vmax.xlane.f32.xlu1 %v1485_v7 }
 0x3db   : > { %v1466_v8 = vpop.xlane.xlu1 %1465 }
 0x3dc   : > { %v1488_v10 = vsub.f32 %v1456_v16, %v1466_v8 }
 0x3de   : > { %v1496_v13 = vmul.f32 1.442695, %v1488_v10 }
 0x3df   : > { %v1469_v9 = vpop.xlane.xlu0 %1468 }
 0x3e0   : > { %1657 = vrot.lane.b32.xlu1 %v5769_v37, %s5528_s2  ;;  %v1489_v12 = vsub.f32 %v1457_v24, %v1469_v9  ;;  %5386 = vpow2.f32 %v1496_v13 }
 0x3e2   : > { %v1498_v14 = vmul.f32 1.442695, %v1489_v12 }
 0x3e4   : > { %5388 = vpow2.f32 %v1498_v14 }
 0x3e5   : > { %1705 = vrot.lane.b32.xlu0 %v5771_v38, %s5528_s2 }
 0x3ea   : > { %v5387_v15 = vpop.eup %5386 }
 0x3eb   : > { %v1512_v18 = vsel %vm1034_vm4, %v5387_v15, 0.0 }
 0x3ee   : > { %v5389_v17 = vpop.eup %5388 }
 0x3ef   : > { %v1515_v19 = vsel %vm1034_vm4, %v5389_v17, 0.0 }
 0x404   : > { %1513 = vadd.xlane.f32.xlu0 %v1512_v18  ;;  %1516 = vadd.xlane.f32.xlu1 %v1515_v19 }
 0x415   : > { %1753 = vrot.lane.b32.xlu1 %v5775_v41, %s5528_s2 }
 0x44c   : > { %v1472_v37 = vpop.xlane.xlu0 %1471  ;;  %v1475_v38 = vpop.xlane.xlu1 %1474 }
 0x44d   : > { %v1490_v21 = vsub.f32 %v1458_v31, %v1472_v37  ;;  %v1491_v16 = vsub.f32 %v1459_v32, %v1475_v38 }
 0x44f   : > { %v1500_v22 = vmul.f32 1.442695, %v1490_v21  ;;  %v1502_v23 = vmul.f32 1.442695, %v1491_v16 }
 0x451   : > { %5390 = vpow2.f32 %v1500_v22 }
 0x452   : > { %5392 = vpow2.f32 %v1502_v23 }
 0x454   : > { %v1481_v24 = vpop.xlane.xlu1 %1480  ;;  %v1478_v39 = vpop.xlane.xlu0 %1477 }
 0x455   : > { %v1493_v25 = vsub.f32 %v1461_v50, %v1481_v24  ;;  %v1492_v40 = vsub.f32 %v5856_v49, %v1478_v39 }
 0x457   : > { %v1506_v26 = vmul.f32 1.442695, %v1493_v25  ;;  %v1504_v44 = vmul.f32 1.442695, %v1492_v40 }
 0x459   : > { %5394 = vpow2.f32 %v1506_v26 }
 0x45b   : > { %v5874_v27 = vpop.eup %5390 }
 0x45c   : > { %v5876_v28 = vpop.eup %5392  ;;  %v1487_v29 = vpop.xlane.xlu1 %1486  ;;  %v1518_v41 = vsel %vm1034_vm4, %v5874_v27, 0.0 }
 0x45d   : > { %v1495_v30 = vsub.f32 %v1463_v62, %v1487_v29  ;;  %1519 = vadd.xlane.f32.xlu0 %v1518_v41  ;;  %v1521_v31 = vsel %vm1034_vm4, %v5876_v28, 0.0  ;;  %v1484_v43 = vpop.xlane.xlu0 %1483 }
 0x45e   : > { %1522 = vadd.xlane.f32.xlu1 %v1521_v31  ;;  %v1494_v47 = vsub.f32 %v5861_v61, %v1484_v43 }
 0x45f   : > { %v1510_v32 = vmul.f32 1.442695, %v1495_v30 }
 0x460   : > { %v1508_v48 = vmul.f32 1.442695, %v1494_v47  ;;  %v1658_v51 = vpop.permute.xlu1 %1657 }
 0x461   : > { %5396 = vpow2.f32 %v1510_v32  ;;  %v1706_v50 = vpop.permute.xlu0 %1705  ;;  %v1663_v61 = vsel %vm1565_vm5, %v1658_v51, 0 }
 0x462   : > { %5398 = vpow2.f32 %v1504_v44  ;;  %v1711_v62 = vsel %vm1565_vm5, %v1706_v50, 0 }
 0x463   : > { %v5882_v33 = vpop.eup %5394  ;;  %5400 = vpow2.f32 %v1508_v48 }
 0x464   : > { %v1527_v34 = vsel %vm1034_vm4, %v5882_v33, 0.0 }
 0x465   : > { %1528 = vadd.xlane.f32.xlu1 %v1527_v34 }
 0x46b   : > { %v5886_v35 = vpop.eup %5396 }
 0x46c   : > { %v1533_v36 = vsel %vm1034_vm4, %v5886_v35, 0.0  ;;  %v5896_v52 = vpop.eup %5398 }
 0x46d   : > { %1534 = vadd.xlane.f32.xlu1 %v1533_v36  ;;  %v5900_v49 = vpop.eup %5400 }
 0x473   : > { %1801 = vrot.lane.b32.xlu0 %v5777_v42, %s5528_s2  ;;  %v1524_v42 = vsel %vm1034_vm4, %v5896_v52, 0.0 }
 0x47e   : > { %1849 = vrot.lane.b32.xlu1 %v5783_v45, %s5528_s2  ;;  %v1530_v45 = vsel %vm1034_vm4, %v5900_v49, 0.0 }
 0x491   : > { %v1514_v53 = vpop.xlane.xlu0 %1513  ;;  %v1517_v54 = vpop.xlane.xlu1 %1516 }
 0x492   : > { %5402 = vrcp.f32 %v1514_v53  ;;  %1525 = vadd.xlane.f32.xlu0 %v1524_v42 }
 0x493   : > { %5404 = vrcp.f32 %v1517_v54 }
 0x495   : > { %v1754_v63 = vpop.permute.xlu1 %1753 }
 0x496   : > { %1531 = vadd.xlane.f32.xlu0 %v1530_v45  ;;  %v1759_v12 = vsel %vm1565_vm5, %v1754_v63, 0 }
 0x49c   : > { %v5403_v55 = vpop.eup %5402 }
 0x49d   : > { %v5405_v56 = vpop.eup %5404  ;;  %v1544_v57 = vmul.f32 %v5403_v55, %v5387_v15  ;;  %v5256_v55 = vld [vmem:[%s5674_s30] sm:$0xff]  }
 0x49e   : > { %v1545_v58 = vmul.f32 %v5405_v56, %v5389_v17 }
 0x49f   : > { %v1552_v59 = vpack.c.bf16 %v1544_v57, %v1544_v57 }
 0x4a0   : > { %v1553_v60 = vpack.c.bf16 %v1545_v58, %v1545_v58 }
 0x4a1   : > { %5123 = vmatmul.mubr.msk.bf16.vlgmr.msra.gmra.mrb[16].mxu1 %vm1034_vm4, %v1552_v59 }
 0x4a2   : > { %5129 = vmatmul.mubr.msk.bf16.vlgmr.msra.gmra.mrb[20].mxu0 %vm1034_vm4, %v1553_v60  ;;  %5133 = vmatpush3.bf16.msra.mxu1 %v1663_v61  ;;  %v5257_v61 = vld [vmem:[%s5674_s30 + $0x8] sm:$0xff]   ;;  %s6418_s30 = sld [smem:[#allocation14_spill]] (!%p4807_p6) }
 0x4a3   : > { %5139 = vmatpush3.bf16.msra.mxu0 %v1711_v62  ;;  %5134 = vmatprep.mubr.msk.bf16.mxu1 %vm5523_vm2, %v5522_v20 }
 0x4a4   : > { %5140 = vmatprep.mubr.msk.bf16.mxu0 %vm5523_vm2, %v5522_v20  ;;  %5144 = vmatprep.subr.bf16.mxu1 %v5522_v20 }
 0x4a5   : > { %5150 = vmatprep.subr.bf16.mxu0 %v5522_v20 }
 0x4ac   : > { %1897 = vrot.lane.b32.xlu0 %v5785_v46, %s5528_s2 }
 0x4ea   : > { %v1520_v0 = vpop.xlane.xlu0 %1519 }
 0x4eb   : > { %5406 = vrcp.f32 %v1520_v0  ;;  %v1523_v1 = vpop.xlane.xlu1 %1522 }
 0x4ec   : > { %5408 = vrcp.f32 %v1523_v1 }
 0x4ee   : > { %v1802_v8 = vpop.permute.xlu0 %1801 }
 0x4ef   : > { %v1807_v46 = vsel %vm1565_vm5, %v1802_v8, 0 }
 0x4f2   : > { %v1529_v2 = vpop.xlane.xlu1 %1528 }
 0x4f3   : > { %5410 = vrcp.f32 %v1529_v2 }
 0x4f5   : > { %v5407_v3 = vpop.eup %5406 }
 0x4f6   : > { %v5409_v5 = vpop.eup %5408  ;;  %v1546_v6 = vmul.f32 %v5407_v3, %v5874_v27 }
 0x4f7   : > { %v1547_v7 = vmul.f32 %v5409_v5, %v5876_v28 }
 0x4f8   : > { %v1554_v9 = vpack.c.bf16 %v1546_v6, %v1546_v6 }
 0x4f9   : > { %v1555_v10 = vpack.c.bf16 %v1547_v7, %v1547_v7 }
 0x4fa   : > { %5135 = vmatmul.mubr.msk.bf16.vlgmr.msra.gmra.mrb[20].mxu1 %vm1034_vm4, %v1554_v9  ;;  %v1535_v17 = vpop.xlane.xlu1 %1534 }
 0x4fb   : > { %5141 = vmatmul.mubr.msk.bf16.vlgmr.msra.gmra.mrb[24].mxu0 %vm1034_vm4, %v1555_v10  ;;  %5145 = vmatpush3.bf16.msra.mxu1 %v1759_v12  ;;  %5412 = vrcp.f32 %v1535_v17 }
 0x4fc   : > { %5151 = vmatpush3.bf16.msra.mxu0 %v1807_v46  ;;  %5152 = vmatprep.mubr.msk.bf16.mxu0 %vm5523_vm2, %v5522_v20 }
 0x4fd   : > { %5162 = vmatprep.subr.bf16.mxu0 %v5522_v20  ;;  %5146 = vmatprep.mubr.msk.bf16.mxu1 %vm5523_vm2, %v5522_v20  ;;  %v5411_v13 = vpop.eup %5410 }
 0x4fe   : > { %5156 = vmatprep.subr.bf16.mxu1 %v5522_v20  ;;  %v1549_v14 = vmul.f32 %v5411_v13, %v5882_v33  ;;  %v1850_v25 = vpop.permute.xlu1 %1849 }
 0x4ff   : > { %v1855_v28 = vsel %vm1565_vm5, %v1850_v25, 0 }
 0x500   : > { %v1557_v15 = vpack.c.bf16 %v1549_v14, %v1549_v14 }
 0x503   : > { %5153 = vmatmul.mubr.msk.bf16.vlgmr.msra.gmra.mrb[28].mxu0 %vm1034_vm4, %v1557_v15 }
 0x504   : > { %5164 = vmatprep.mubr.msk.bf16.mxu0 %vm5523_vm2, %v5522_v20 }
 0x505   : > { %v5413_v19 = vpop.eup %5412 }
 0x506   : > { %v1551_v38 = vmul.f32 %v5413_v19, %v5886_v35 }
 0x508   : > { %v1559_v23 = vpack.c.bf16 %v1551_v38, %v1551_v38 }
 0x51f   : > { %v1526_v18 = vpop.xlane.xlu0 %1525 }
 0x520   : > { %5414 = vrcp.f32 %v1526_v18 }
 0x523   : > { %v1532_v37 = vpop.xlane.xlu0 %1531 }
 0x524   : > { %5416 = vrcp.f32 %v1532_v37 }
 0x527   : > { %v1898_v21 = vpop.permute.xlu0 %1897 }
 0x528   : > { %v1903_v16 = vsel %vm1565_vm5, %v1898_v21, 0 }
 0x529   : > { %5163 = vmatpush3.bf16.msra.mxu0 %v1903_v16 }
 0x52a   : > { %v5415_v22 = vpop.eup %5414 }
 0x52b   : > { %v1548_v24 = vmul.f32 %v5415_v22, %v5896_v52  ;;  %v4630_v22 = vld [vmem:[%s6414_s0] ss:$0 sm:$0xff] }
 0x52c   : > { %5165 = vmatmul.mubr.msk.bf16.vlgmr.msra.gmra.mrb[32].mxu0 %vm1034_vm4, %v1559_v23 }
 0x52d   : > { %v1556_v26 = vpack.c.bf16 %v1548_v24, %v1548_v24 }
 0x52e   : > { %v5417_v27 = vpop.eup %5416 }
 0x52f   : > { %5147 = vmatmul.mubr.msk.bf16.vlgmr.msra.gmra.mrb[24].mxu1 %vm1034_vm4, %v1556_v26  ;;  %v1550_v29 = vmul.f32 %v5417_v27, %v5900_v49  ;;  %v5426_v27 = vld [vmem:[#allocation2] sm:$0xff] }
 0x530   : > { %5157 = vmatpush3.bf16.msra.mxu1 %v1855_v28  ;;  %5158 = vmatprep.mubr.msk.bf16.mxu1 %vm5523_vm2, %v5522_v20 }
 0x531   : > { %5168 = vmatprep.subr.bf16.mxu1 %v5522_v20  ;;  %v1558_v41 = vpack.c.bf16 %v1550_v29, %v1550_v29 }
 0x537   : > { %5159 = vmatmul.mubr.msk.bf16.vlgmr.msra.gmra.mrb[28].mxu1 %vm1034_vm4, %v1558_v41 }
 0x538   : > { %5172 = vmatprep.mubr.msk.bf16.mxu1 %vm5523_vm2, %v5522_v20  ;;  %5169 = vmatpush3.bf16.msra.mxu1 %v5256_v55 }
 0x539   : > { %5170 = vmatprep.subr.bf16.mxu1 %v5522_v20 }
 0x53c   : > { %5171 = vmatpush3.bf16.msra.mxu1 %v5257_v61  ;;  %v5533_v61 = vmov 0  }
 0x53d   : > { %2410 = vmatprep.mubr.bf16.mxu0 %v5533_v61 }
 0x574   : > { %v1603_v30 = vpop.f32.mrb[16].mxu1 }
 0x575   : > { %v1651_v31 = vpop.f32.mrb[20].mxu0  ;;  %v5124_v32 = vpop.f32.mrb[17].mxu1 }
 0x576   : > { %v5130_v33 = vpop.f32.mrb[21].mxu0  ;;  %v1606_v34 = vpop.f32.mrb[18].mxu1 }
 0x577   : > { %v1654_v35 = vpop.f32.mrb[22].mxu0  ;;  %v5125_v36 = vpop.f32.mrb[19].mxu1 }
 0x578   : > { %v5131_v39 = vpop.f32.mrb[23].mxu0 }
 0x5cd   : > { %v1699_v40 = vpop.f32.mrb[20].mxu1 }
 0x5ce   : > { %v1747_v43 = vpop.f32.mrb[24].mxu0  ;;  %v5136_v44 = vpop.f32.mrb[21].mxu1 }
 0x5cf   : > { %v5239_v47 = vpack.i.bf16 %v1747_v43, %v1699_v40  ;;  %v5142_v48 = vpop.f32.mrb[25].mxu0  ;;  %v1702_v50 = vpop.f32.mrb[22].mxu1  ;;  %v2099_v40 = vld [vmem:[%s5692_s6] sm:$0xff]  ;;  %v2100_v44 = vld [vmem:[%s5692_s6 + $0x8] sm:$0xff] }
 0x5d0   : > { %v1750_v51 = vpop.f32.mrb[26].mxu0  ;;  %v5137_v52 = vpop.f32.mrb[23].mxu1  ;;  %v2107_v43 = vld [vmem:[%s5692_s6 + $0x40] sm:$0xff]  ;;  %v2108_v48 = vld [vmem:[%s5692_s6 + $0x48] sm:$0xff] }
 0x5d1   : > { %5240 = vrot.lane.b32.xlu1 %v5239_v47, %s5530_s4  ;;  %v5143_v53 = vpop.f32.mrb[27].mxu0  ;;  %v4637_v47 = vcombine.high %v2099_v40, %v2107_v43  ;;  %v4636_v50 = vcombine.low %v2099_v40, %v2107_v43  ;;  %v4638_v51 = vcombine.low %v2100_v44, %v2108_v48  ;;  %v4639_v52 = vcombine.high %v2100_v44, %v2108_v48  ;;  %v2104_v40 = vld [vmem:[%s5692_s6 + $0x28] sm:$0xff] }
 0x5d2   : > { %v2115_v53 = vld [vmem:[%s5692_s6 + $0x80] sm:$0xff]  ;;  %v2112_v43 = vld [vmem:[%s5692_s6 + $0x68] sm:$0xff] }
 0x5d3   : > { %2378 = vmatprep.subr.bf16.mxu0 %v4637_v47  ;;  %2421 = vmatprep.subr.bf16.mxu1 %v4639_v52  ;;  %v2127_v52 = vld [vmem:[%s5692_s6 + $0xe0] sm:$0xff] }
 0x5d4   : > { %2379 = vmatpush1.bf16.msra.mxu0 %v4636_v50  ;;  %v4647_v50 = vcombine.high %v2104_v40, %v2112_v43 }
 0x5d6   : > { %v1843_v54 = vpop.f32.mrb[28].mxu0 }
 0x5d7   : > { %v5154_v42 = vpop.f32.mrb[29].mxu0 }
 0x5d8   : > { %v1846_v49 = vpop.f32.mrb[30].mxu0  ;;  %v2116_v42 = vld [vmem:[%s5692_s6 + $0x88] sm:$0xff] }
 0x5d9   : > { %v5155_v45 = vpop.f32.mrb[31].mxu0 }
 0x5da   : > { %v2124_v45 = vld [vmem:[%s5692_s6 + $0xc8] sm:$0xff] }
 0x5ff   : > { %v1939_v56 = vpop.f32.mrb[32].mxu0 }
 0x600   : > { %v5166_v57 = vpop.f32.mrb[33].mxu0 }
 0x601   : > { %v1942_v58 = vpop.f32.mrb[34].mxu0  ;;  %v4655_v57 = vcombine.high %v2116_v42, %v2124_v45 }
 0x602   : > { %v1795_v59 = vpop.f32.mrb[24].mxu1  ;;  %v5167_v60 = vpop.f32.mrb[35].mxu0  ;;  %v2101_v58 = vld [vmem:[%s5692_s6 + $0x10] sm:$0xff] }
 0x603   : > { %v5244_v62 = vpack.i.bf16 %v1843_v54, %v1795_v59  ;;  %v5148_v63 = vpop.f32.mrb[25].mxu1  ;;  %v2123_v54 = vld [vmem:[%s5692_s6 + $0xc0] sm:$0xff]  ;;  %v2109_v59 = vld [vmem:[%s5692_s6 + $0x50] sm:$0xff]  ;;  %v2102_v60 = vld [vmem:[%s5692_s6 + $0x18] sm:$0xff] }
 0x604   : > { %v1798_v0 = vpop.f32.mrb[26].mxu1  ;;  %v4653_v49 = vcombine.high %v2115_v53, %v2123_v54  ;;  %v4652_v55 = vcombine.low %v2115_v53, %v2123_v54  ;;  %v4641_v63 = vcombine.high %v2101_v58, %v2109_v59  ;;  %v2120_v53 = vld [vmem:[%s5692_s6 + $0xa8] sm:$0xff] }
 0x605   : > { %v5149_v1 = vpop.f32.mrb[27].mxu1  ;;  %5245 = vrot.lane.b32.xlu0 %v5244_v62, %s5531_s18  ;;  %v4640_v62 = vcombine.low %v2101_v58, %v2109_v59  ;;  %v2110_v0 = vld [vmem:[%s5692_s6 + $0x58] sm:$0xff]  ;;  %v2128_v54 = vld [vmem:[%s5692_s6 + $0xe8] sm:$0xff]  ;;  %s6417_s18 = scalar_lea.vmem %s6385_s16, %s5659_s19  ;;  %s5535_s19 = smov (!%p4807_p6), 64  }
 0x606   : > { %2380 = vmatprep.subr.bf16.mxu0 %v4653_v49  ;;  %v4642_v1 = vcombine.low %v2102_v60, %v2110_v0  ;;  %v4646_v49 = vcombine.low %v2104_v40, %v2112_v43  ;;  %v2106_v58 = vld [vmem:[%s5692_s6 + $0x38] sm:$0xff] }
 0x607   : > { %2381 = vmatpush1.bf16.msra.mxu0 %v4652_v55  ;;  %v4663_v55 = vcombine.high %v2120_v53, %v2128_v54  ;;  %v2114_v59 = vld [vmem:[%s5692_s6 + $0x78] sm:$0xff] }
 0x608   : > { %2464 = vmatprep.subr.bf16.mxu0 %v4641_v63  ;;  %v5286_v40 = vld [vmem:[%s5707_s20 + $0x78] sm:$0xff]  }
 0x609   : > { %v5287_v43 = vld [vmem:[%s5707_s20 + $0xf8] sm:$0xff]  }
 0x60a   : > { %v1891_v2 = vpop.f32.mrb[28].mxu1 }
 0x60b   : > { %v5249_v3 = vpack.i.bf16 %v1939_v56, %v1891_v2  ;;  %v5160_v5 = vpop.f32.mrb[29].mxu1  ;;  %v4654_v56 = vcombine.low %v2116_v42, %v2124_v45  ;;  %v4643_v2 = vcombine.high %v2102_v60, %v2110_v0  ;;  %v4651_v0 = vcombine.high %v2106_v58, %v2114_v59 }
 0x60c   : > { %v1894_v6 = vpop.f32.mrb[30].mxu1 }
 0x60d   : > { %v5161_v7 = vpop.f32.mrb[31].mxu1  ;;  %5250 = vrot.lane.b32.xlu1 %v5249_v3, %s5532_s22 }
 0x643   : > { %v5241_v20 = vpop.permute.xlu1 %5240 }
 0x644   : > { %v5243_v9 = vunpack.i.h.bf16 %v5241_v20  ;;  %v5242_v10 = vunpack.i.l.bf16 %v5241_v20 }
 0x646   : > { %v1970_v14 = vsel %vm1034_vm4, %v1651_v31, %v5243_v9  ;;  %v1969_v15 = vsel %vm1034_vm4, %v1603_v30, %v5242_v10  ;;  %v5427_v30 = vld [vmem:[#allocation2 + $0x8] sm:$0xff] }
 0x677   : > { %v5246_v8 = vpop.permute.xlu0 %5245 }
 0x678   : > { %v5248_v12 = vunpack.i.h.bf16 %v5246_v8  ;;  %v5247_v46 = vunpack.i.l.bf16 %v5246_v8 }
 0x67a   : > { %v1973_v19 = vsel %vm1971_vm6, %v1970_v14, %v5248_v12  ;;  %v1972_v37 = vsel %vm1971_vm6, %v1969_v15, %v5247_v46 }
 0x67f   : > { %v5251_v13 = vpop.permute.xlu1 %5250 }
 0x680   : > { %v5253_v17 = vunpack.i.h.bf16 %v5251_v13  ;;  %v5252_v18 = vunpack.i.l.bf16 %v5251_v13 }
 0x682   : > { %v1976_v38 = vsel %vm1974_vm7, %v1973_v19, %v5253_v17  ;;  %v1975_v21 = vsel %vm1974_vm7, %v1972_v37, %v5252_v18 }
 0x683   : > { %v1977_v16 = vpack.c.bf16 %v1976_v38, %v1975_v21 }
 0x685   : > { %5173 = vmatmul.mubr.msk.bf16.vlgmr.msra.gmra.mrb[32].mxu1 %vm963_vm3, %v1977_v16  ;;  %v4634_v16 = vld [vmem:[%s6415_s23] ss:$0 sm:$0xff] }
 0x686   : > { %2422 = vmatpush1.bf16.msra.mxu1 %v4638_v51  ;;  %2453 = vmatprep.mubr.bf16.mxu1 %v5533_v61  ;;  %v2119_v51 = vld [vmem:[%s5692_s6 + $0xa0] sm:$0xff] }
 0x687   : > { %2423 = vmatprep.subr.bf16.mxu1 %v4655_v57  ;;  %v4661_v45 = vcombine.high %v2119_v51, %v2127_v52  ;;  %v2113_v57 = vld [vmem:[%s5692_s6 + $0x70] sm:$0xff]  ;;  %v4660_v60 = vcombine.low %v2119_v51, %v2127_v52  ;;  %v2161_v51 = vsub.s32 6, %v5841_v4  ;;  %v6082_v52 = vld [vmem:[%s5697_s7 + $0x8] sm:$0xff] }
 0x68a   : > { %2424 = vmatpush1.bf16.msra.mxu1 %v4654_v56  ;;  %v2105_v56 = vld [vmem:[%s5692_s6 + $0x30] sm:$0xff] }
 0x68b   : > { %2507 = vmatprep.subr.bf16.mxu1 %v4643_v2  ;;  %v4649_v63 = vcombine.high %v2105_v56, %v2113_v57  ;;  %v2129_v2 = vld [vmem:[%s5692_s6 + $0xf0] sm:$0xff] }
 0x758   : > { %v2038_v23 = vpop.f32.mrb[32].mxu1 }
 0x759   : > { %v2039_v24 = vadd.f32 %v4630_v22, %v2038_v23  ;;  %v5174_v25 = vpop.f32.mrb[33].mxu1 }
 0x75a   : > { %v2041_v26 = vpop.f32.mrb[34].mxu1 }
 0x75b   : > { %v5956_v28 = vadd.f32 %v5426_v27, %v2039_v24  ;;  %v2042_v29 = vadd.f32 %v4630_v22, %v2041_v26  ;;  %v5175_v41 = vpop.f32.mrb[35].mxu1  ;;  %v4635_v26 = vld [vmem:[%s6416_s24] ss:$0 sm:$0xff] }
 0x75c   : > { %v2118_v41 = vld [vmem:[%s5692_s6 + $0x98] sm:$0xff] }
 0x75d   : > { %v5958_v31 = vadd.f32 %v5427_v30, %v2042_v29  ;;  %v2047_v32 = vsel %vm963_vm3, %v5956_v28, 0.0  ;;  %v2056_v33 = vmul.f32 %v5956_v28, %v5956_v28  ;;  %v2125_v29 = vld [vmem:[%s5692_s6 + $0xd0] sm:$0xff]  ;;  %v2126_v30 = vld [vmem:[%s5692_s6 + $0xd8] sm:$0xff] }
 0x75e   : > { %2048 = vadd.xlane.f32.xlu0 %v2047_v32  ;;  %v4658_v47 = vcombine.low %v2118_v41, %v2126_v30 }
 0x75f   : > { %v2050_v34 = vsel %vm963_vm3, %v5958_v31, 0.0  ;;  %v2058_v35 = vsel %vm963_vm3, %v2056_v33, 0.0  ;;  %v2057_v36 = vmul.f32 %v5958_v31, %v5958_v31 }
 0x760   : > { %2051 = vadd.xlane.f32.xlu1 %v2050_v34 }
 0x761   : > { %v2061_v39 = vsel %vm963_vm3, %v2057_v36, 0.0  ;;  %v2103_v36 = vld [vmem:[%s5692_s6 + $0x20] sm:$0xff] }
 0x762   : > { %2059 = vadd.xlane.f32.xlu0 %v2058_v35  ;;  %v4659_v35 = vcombine.high %v2118_v41, %v2126_v30  ;;  %v5279_v41 = vld [vmem:[%s5707_s20 + $0xe8] sm:$0xff]  }
 0x763   : > { %v5280_v30 = vld [vmem:[%s5707_s20 + $0x28] sm:$0xff]  }
 0x766   : > { %2062 = vadd.xlane.f32.xlu0 %v2061_v39  ;;  %v2111_v39 = vld [vmem:[%s5692_s6 + $0x60] sm:$0xff] }
 0x767   : > { %v4645_v48 = vcombine.high %v2103_v36, %v2111_v39  ;;  %v4644_v42 = vcombine.low %v2103_v36, %v2111_v39  ;;  %v5284_v36 = vld [vmem:[%s5707_s20 + $0x30] sm:$0xff]  }
 0x768   : > { %v5285_v39 = vld [vmem:[%s5707_s20 + $0xb0] sm:$0xff]  }
 0x7eb   : > { %v2049_v3 = vpop.xlane.xlu0 %2048 }
 0x7ec   : > { %v2054_v5 = vmul.f32 0.03125, %v2049_v3  ;;  %v2122_v3 = vld [vmem:[%s5692_s6 + $0xb8] sm:$0xff] }
 0x7ed   : > { %v2052_v6 = vpop.xlane.xlu1 %2051 }
 0x7ee   : > { %v2066_v20 = vmul.f32 %v2054_v5, %v2054_v5  ;;  %v2055_v8 = vmul.f32 0.03125, %v2052_v6  ;;  %v2072_v37 = vsub.f32 %v5956_v28, %v2054_v5  ;;  %v2117_v28 = vld [vmem:[%s5692_s6 + $0x90] sm:$0xff]  ;;  %v2130_v5 = vld [vmem:[%s5692_s6 + $0xf8] sm:$0xff]  ;;  %v4648_v6 = vcombine.low %v2105_v56, %v2113_v57 }
 0x7ef   : > { %v2060_v7 = vpop.xlane.xlu0 %2059  ;;  %v4657_v34 = vcombine.high %v2117_v28, %v2125_v29  ;;  %v4656_v44 = vcombine.low %v2117_v28, %v2125_v29  ;;  %v5277_v28 = vld [vmem:[%s5707_s20 + $0xa0] sm:$0xff]   ;;  %v5278_v29 = vld [vmem:[%s5707_s20 + $0x68] sm:$0xff]  }
 0x7f0   : > { %v2064_v9 = vmul.f32 0.03125, %v2060_v7  ;;  %v2067_v46 = vmul.f32 %v2055_v8, %v2055_v8  ;;  %v2073_v22 = vsub.f32 %v5958_v31, %v2055_v8  ;;  %v4650_v7 = vcombine.low %v2106_v58, %v2114_v59 }
 0x7f1   : > { %v4667_v8 = vcombine.high %v2122_v3, %v2130_v5  ;;  %v2153_v59 = vsub.s32 4, %v5841_v4 }
 0x7f2   : > { %v2068_v10 = vsub.f32 %v2064_v9, %v2066_v20 }
 0x7f3   : > { %v2063_v12 = vpop.xlane.xlu0 %2062 }
 0x7f4   : > { %v2070_v13 = vmax.f32 %v2068_v10, 0.0  ;;  %v2065_v14 = vmul.f32 0.03125, %v2063_v12  ;;  %v4666_v10 = vcombine.low %v2122_v3, %v2130_v5  ;;  %v5258_v12 = vld [vmem:[%s5707_s20 + $0x40] sm:$0xff]  }
 0x7f6   : > { %v2074_v15 = vadd.f32 1e-05, %v2070_v13  ;;  %v2069_v17 = vsub.f32 %v2065_v14, %v2067_v46  ;;  %v5259_v46 = vld [vmem:[%s5707_s20 + $0xc0] sm:$0xff]  }
 0x7f7   : > { %v5260_v13 = vld [vmem:[%s5707_s20] sm:$0xff]  }
 0x7f8   : > { %5418 = vrsqrt.f32 %v2074_v15  ;;  %v2071_v18 = vmax.f32 %v2069_v17, 0.0  ;;  %v5261_v14 = vld [vmem:[%s5707_s20 + $0x80] sm:$0xff]   ;;  %v5262_v15 = vld [vmem:[%s5707_s20 + $0x48] sm:$0xff]  }
 0x7f9   : > { %v5263_v17 = vld [vmem:[%s5707_s20 + $0xc8] sm:$0xff]  }
 0x7fa   : > { %v2075_v19 = vadd.f32 1e-05, %v2071_v18  ;;  %v5265_v18 = vld [vmem:[%s5707_s20 + $0x88] sm:$0xff]  }
 0x7fc   : > { %5420 = vrsqrt.f32 %v2075_v19  ;;  %v5266_v19 = vld [vmem:[%s5707_s20 + $0x50] sm:$0xff]  }
 0x802   : > { %v5419_v38 = vpop.eup %5418 }
 0x803   : > { %v2078_v21 = vmul.f32 %v5419_v38, %v2072_v37  ;;  %v5267_v37 = vld [vmem:[%s5707_s20 + $0xd0] sm:$0xff]  }
 0x804   : > { %v5268_v38 = vld [vmem:[%s5707_s20 + $0x10] sm:$0xff]  }
 0x805   : > { %v2087_v24 = vmul.f32 %v4634_v16, %v2078_v21  ;;  %v5269_v21 = vld [vmem:[%s5707_s20 + $0x90] sm:$0xff]  }
 0x806   : > { %v5421_v23 = vpop.eup %5420 }
 0x807   : > { %v2079_v25 = vmul.f32 %v5421_v23, %v2073_v22  ;;  %v6000_v32 = vadd.f32 %v4635_v26, %v2087_v24  ;;  %v5271_v22 = vld [vmem:[%s5707_s20 + $0xd8] sm:$0xff]  }
 0x808   : > { %v5272_v23 = vld [vmem:[%s5707_s20 + $0x18] sm:$0xff]  }
 0x809   : > { %v2088_v27 = vmul.f32 %v4634_v16, %v2079_v25  ;;  %v5270_v16 = vld [vmem:[%s5707_s20 + $0x58] sm:$0xff]   ;;  %v5274_v25 = vld [vmem:[%s5707_s20 + $0x60] sm:$0xff]  }
 0x80a   : > { %v5273_v24 = vld [vmem:[%s5707_s20 + $0x98] sm:$0xff]  }
 0x80b   : > { %v6002_v33 = vadd.f32 %v4635_v26, %v2088_v27  ;;  %v5275_v26 = vld [vmem:[%s5707_s20 + $0xe0] sm:$0xff]  }
 0x80c   : > { %v5276_v27 = vld [vmem:[%s5707_s20 + $0x20] sm:$0xff]  }
 0x80d   : > { %v6006_v31 = vpack.c.bf16 %v6002_v33, %v6000_v32 }
 0x80f   : > { %4668 = vmatmul.mubr.msk.bf16.vlgmr.msra.gmra.mrb[36].mxu0 %vm963_vm3, %v6006_v31  ;;  %4669 = vmatmul.mubr.msk.bf16.vlgmr.msra.gmra.mrb[36].mxu1 %vm963_vm3, %v6006_v31 }
 0x810   : > { %2465 = vmatpush1.bf16.msra.mxu0 %v4640_v62  ;;  %2508 = vmatpush1.bf16.msra.mxu1 %v4642_v1  ;;  %v4662_v62 = vcombine.low %v2120_v53, %v2128_v54  ;;  %v2121_v1 = vld [vmem:[%s5692_s6 + $0xb0] sm:$0xff]  ;;  %v6085_v53 = vrot.slane %v6082_v52, %v2161_v51  ;;  %v2145_v54 = vsub.s32 2, %v5841_v4 }
 0x811   : > { %2466 = vmatprep.subr.bf16.mxu0 %v4657_v34  ;;  %2509 = vmatprep.subr.bf16.mxu1 %v4659_v35  ;;  %v4665_v20 = vcombine.high %v2121_v1, %v2129_v2  ;;  %v4664_v9 = vcombine.low %v2121_v1, %v2129_v2  ;;  %v5282_v34 = vld [vmem:[%s5707_s20 + $0x70] sm:$0xff]  }
 0x812   : > { %2496 = vmatprep.mubr.bf16.mxu0 %v5533_v61  ;;  %2539 = vmatprep.mubr.bf16.mxu1 %v5533_v61  ;;  %v5283_v35 = vld [vmem:[%s5707_s20 + $0xf0] sm:$0xff]  }
 0x814   : > { %2467 = vmatpush1.bf16.msra.mxu0 %v4656_v44  ;;  %2510 = vmatpush1.bf16.msra.mxu1 %v4658_v47  ;;  %v5288_v44 = vld [vmem:[%s5707_s20 + $0x38] sm:$0xff]  }
 0x815   : > { %2550 = vmatprep.subr.bf16.mxu0 %v4645_v48  ;;  %2593 = vmatprep.subr.bf16.mxu1 %v4647_v50  ;;  %v5289_v47 = vld [vmem:[%s5707_s20 + $0xb8] sm:$0xff]   ;;  %v5290_v48 = vld [vmem:[%s5707_s20 + $0x140] sm:$0xff]  }
 0x816   : > { %v5291_v50 = vld [vmem:[%s5707_s20 + $0x1c0] sm:$0xff]  }
 0x817   : > { %4670 = vmatmul.mubr.msk.bf16.vlgmr.msra.gmra.mrb[40].mxu0 %vm963_vm3, %v6006_v31  ;;  %4671 = vmatmul.mubr.msk.bf16.vlgmr.msra.gmra.mrb[40].mxu1 %vm963_vm3, %v6006_v31 }
 0x818   : > { %2551 = vmatpush1.bf16.msra.mxu0 %v4644_v42  ;;  %2594 = vmatpush1.bf16.msra.mxu1 %v4646_v49  ;;  %v2131_v42 = vld [vmem:[%s5697_s7] sm:$0xff]  ;;  %v6090_v49 = vsub.s32 1, %v5841_v4 }
 0x819   : > { %2552 = vmatprep.subr.bf16.mxu0 %v4661_v45  ;;  %2595 = vmatprep.subr.bf16.mxu1 %v4663_v55  ;;  %v2149_v45 = vsub.s32 3, %v5841_v4  ;;  %v2138_v55 = vrot.slane %v2131_v42, %v5848_v11  ;;  %v2146_v56 = vrot.slane %v2131_v42, %v2145_v54 }
 0x81a   : > { %2582 = vmatprep.mubr.bf16.mxu0 %v5533_v61  ;;  %2625 = vmatprep.mubr.bf16.mxu1 %v5533_v61  ;;  %v2142_v57 = vrot.slane %v2131_v42, %v6090_v49 }
 0x81b   : > { %v2150_v58 = vrot.slane %v2131_v42, %v2149_v45 }
 0x81c   : > { %2553 = vmatpush1.bf16.msra.mxu0 %v4660_v60  ;;  %2596 = vmatpush1.bf16.msra.mxu1 %v4662_v62 }
 0x81d   : > { %2636 = vmatprep.subr.bf16.mxu0 %v4649_v63  ;;  %2679 = vmatprep.subr.bf16.mxu1 %v4651_v0  ;;  %v2157_v63 = vsub.s32 5, %v5841_v4  ;;  %v2165_v0 = vsub.s32 7, %v5841_v4 }
 0x81f   : > { %4672 = vmatmul.mubr.msk.bf16.vlgmr.msra.gmra.mrb[44].mxu0 %vm963_vm3, %v6006_v31  ;;  %4673 = vmatmul.mubr.msk.bf16.vlgmr.msra.gmra.mrb[44].mxu1 %vm963_vm3, %v6006_v31 }
 0x820   : > { %2637 = vmatpush1.bf16.msra.mxu0 %v4648_v6  ;;  %2680 = vmatpush1.bf16.msra.mxu1 %v4650_v7 }
 0x821   : > { %2638 = vmatprep.subr.bf16.mxu0 %v4665_v20  ;;  %2681 = vmatprep.subr.bf16.mxu1 %v4667_v8 }
 0x822   : > { %2668 = vmatprep.mubr.bf16.mxu0 %v5533_v61  ;;  %2711 = vmatprep.mubr.bf16.mxu1 %v5533_v61  ;;  %v5264_v61 = vld [vmem:[%s5707_s20 + $0x8] sm:$0xff]  }
 0x824   : > { %2639 = vmatpush1.bf16.msra.mxu0 %v4664_v9  ;;  %2682 = vmatpush1.bf16.msra.mxu1 %v4666_v10 }
 0x825   : > { %4868 = vmatprep.subr.bf16.mxu0 %v5258_v12  ;;  %4890 = vmatprep.subr.bf16.mxu1 %v5259_v46 }
 0x827   : > { %4674 = vmatmul.mubr.msk.bf16.vlgmr.msra.gmra.mrb[48].mxu0 %vm963_vm3, %v6006_v31  ;;  %4675 = vmatmul.mubr.msk.bf16.vlgmr.msra.gmra.mrb[48].mxu1 %vm963_vm3, %v6006_v31  ;;  %v5281_v31 = vld [vmem:[%s5707_s20 + $0xa8] sm:$0xff]  }
 0x828   : > { %4869 = vmatpush3.bf16.msra.mxu0 %v5260_v13  ;;  %4891 = vmatpush3.bf16.msra.mxu1 %v5261_v14  ;;  %v2154_v13 = vrot.slane %v2131_v42, %v2153_v59  ;;  %v2162_v14 = vrot.slane %v2131_v42, %v2161_v51 }
 0x829   : > { %4870 = vmatprep.subr.bf16.mxu0 %v5262_v15  ;;  %4892 = vmatprep.subr.bf16.mxu1 %v5263_v17 }
 0x82c   : > { %4871 = vmatpush3.bf16.msra.mxu0 %v5264_v61  ;;  %4893 = vmatpush3.bf16.msra.mxu1 %v5265_v18  ;;  %v2158_v61 = vrot.slane %v2131_v42, %v2157_v63  ;;  %v2166_v18 = vrot.slane %v2131_v42, %v2165_v0  ;;  %v2178_v42 = vrot.slane %v6082_v52, %v2145_v54 }
 0x82d   : > { %4872 = vmatprep.subr.bf16.mxu0 %v5266_v19  ;;  %4894 = vmatprep.subr.bf16.mxu1 %v5267_v37  ;;  %v2182_v54 = vrot.slane %v6082_v52, %v2149_v45 }
 0x830   : > { %4873 = vmatpush3.bf16.msra.mxu0 %v5268_v38  ;;  %4895 = vmatpush3.bf16.msra.mxu1 %v5269_v21 }
 0x831   : > { %4874 = vmatprep.subr.bf16.mxu0 %v5270_v16  ;;  %4896 = vmatprep.subr.bf16.mxu1 %v5271_v22 }
 0x834   : > { %4875 = vmatpush3.bf16.msra.mxu0 %v5272_v23  ;;  %4897 = vmatpush3.bf16.msra.mxu1 %v5273_v24 }
 0x835   : > { %4876 = vmatprep.subr.bf16.mxu0 %v5274_v25  ;;  %4898 = vmatprep.subr.bf16.mxu1 %v5275_v26 }
 0x838   : > { %4877 = vmatpush3.bf16.msra.mxu0 %v5276_v27  ;;  %4899 = vmatpush3.bf16.msra.mxu1 %v5277_v28 }
 0x839   : > { %4878 = vmatprep.subr.bf16.mxu0 %v5278_v29  ;;  %4900 = vmatprep.subr.bf16.mxu1 %v5279_v41 }
 0x83c   : > { %4879 = vmatpush3.bf16.msra.mxu0 %v5280_v30  ;;  %4901 = vmatpush3.bf16.msra.mxu1 %v5281_v31  ;;  %v5292_v30 = vld [vmem:[%s5707_s20 + $0x100] sm:$0xff]  }
 0x83d   : > { %4880 = vmatprep.subr.bf16.mxu0 %v5282_v34  ;;  %4902 = vmatprep.subr.bf16.mxu1 %v5283_v35  ;;  %v5293_v31 = vld [vmem:[%s5707_s20 + $0x180] sm:$0xff]  }
 0x840   : > { %4881 = vmatpush3.bf16.msra.mxu0 %v5284_v36  ;;  %4903 = vmatpush3.bf16.msra.mxu1 %v5285_v39 }
 0x841   : > { %4882 = vmatprep.subr.bf16.mxu0 %v5286_v40  ;;  %4904 = vmatprep.subr.bf16.mxu1 %v5287_v43  ;;  %v5294_v40 = vld [vmem:[%s5707_s20 + $0x148] sm:$0xff]  }
 0x842   : > { %v5295_v43 = vld [vmem:[%s5707_s20 + $0x1c8] sm:$0xff]  }
 0x844   : > { %4883 = vmatpush3.bf16.msra.mxu0 %v5288_v44  ;;  %4905 = vmatpush3.bf16.msra.mxu1 %v5289_v47  ;;  %v2170_v44 = vrot.slane %v6082_v52, %v5848_v11 }
 0x845   : > { %4912 = vmatprep.subr.bf16.mxu0 %v5290_v48  ;;  %4934 = vmatprep.subr.bf16.mxu1 %v5291_v50 }
 0x8e2   : > { %v2412_v60 = vpop.f32.mrb[36].mxu0  ;;  %v2455_v62 = vpop.f32.mrb[36].mxu1 }
 0x8e3   : > { %v2413_v1 = vadd.f32 %v2412_v60, %v2138_v55  ;;  %v2456_v2 = vadd.f32 %v2455_v62, %v2146_v56  ;;  %v2414_v3 = vpop.f32.mrb[37].mxu0  ;;  %v2457_v5 = vpop.f32.mrb[37].mxu1  ;;  %v2174_v60 = vrot.slane %v6082_v52, %v6090_v49 }
 0x8e4   : > { %v2415_v6 = vadd.f32 %v2414_v3, %v2142_v57  ;;  %v2458_v7 = vadd.f32 %v2457_v5, %v2150_v58  ;;  %v2416_v20 = vpop.f32.mrb[38].mxu0  ;;  %v2459_v8 = vpop.f32.mrb[38].mxu1  ;;  %v5297_v3 = vld [vmem:[%s5707_s20 + $0x188] sm:$0xff]  }
 0x8e5   : > { %v2417_v9 = vadd.f32 %v2416_v20, %v2138_v55  ;;  %v2460_v10 = vadd.f32 %v2459_v8, %v2146_v56  ;;  %v2418_v12 = vpop.f32.mrb[39].mxu0  ;;  %v2461_v46 = vpop.f32.mrb[39].mxu1  ;;  %v2722_v19 = vmax.f32 %v2413_v1, 0.0  ;;  %v2724_v37 = vmax.f32 %v2456_v2, 0.0  ;;  %v5296_v2 = vld [vmem:[%s5707_s20 + $0x108] sm:$0xff]   ;;  %v5298_v8 = vld [vmem:[%s5707_s20 + $0x150] sm:$0xff]  }
 0x8e6   : > { %v2419_v15 = vadd.f32 %v2418_v12, %v2142_v57  ;;  %v2462_v17 = vadd.f32 %v2461_v46, %v2150_v58  ;;  %v2723_v16 = vmax.f32 %v2415_v6, 0.0  ;;  %v2725_v22 = vmax.f32 %v2458_v7, 0.0 }
 0x8e7   : > { %v2738_v38 = vmax.f32 %v2417_v9, 0.0  ;;  %v2740_v21 = vmax.f32 %v2460_v10, 0.0  ;;  %v5299_v9 = vld [vmem:[%s5707_s20 + $0x1d0] sm:$0xff]  }
 0x8e8   : > { %v2739_v23 = vmax.f32 %v2419_v15, 0.0  ;;  %v2741_v24 = vmax.f32 %v2462_v17, 0.0 }
 0x8e9   : > { %v2754_v25 = vpack.c.bf16 %v2738_v38, %v2722_v19  ;;  %v2756_v26 = vpack.c.bf16 %v2740_v21, %v2724_v37  ;;  %v5300_v19 = vld [vmem:[%s5707_s20 + $0x110] sm:$0xff]  }
 0x8ea   : > { %v2755_v27 = vpack.c.bf16 %v2739_v23, %v2723_v16  ;;  %v2757_v28 = vpack.c.bf16 %v2741_v24, %v2725_v22  ;;  %v2498_v29 = vpop.f32.mrb[40].mxu0  ;;  %v2541_v41 = vpop.f32.mrb[40].mxu1  ;;  %v5301_v37 = vld [vmem:[%s5707_s20 + $0x190] sm:$0xff]   ;;  %v5302_v23 = vld [vmem:[%s5707_s20 + $0x158] sm:$0xff]  }
 0x8eb   : > { %v2499_v34 = vadd.f32 %v2498_v29, %v2154_v13  ;;  %v2542_v35 = vadd.f32 %v2541_v41, %v2162_v14  ;;  %v2500_v36 = vpop.f32.mrb[41].mxu0  ;;  %v2543_v39 = vpop.f32.mrb[41].mxu1  ;;  %v5303_v24 = vld [vmem:[%s5707_s20 + $0x1d8] sm:$0xff]  }
 0x8ec   : > { %v2501_v47 = vadd.f32 %v2500_v36, %v2158_v61  ;;  %v2544_v48 = vadd.f32 %v2543_v39, %v2166_v18  ;;  %v2502_v50 = vpop.f32.mrb[42].mxu0  ;;  %v2545_v51 = vpop.f32.mrb[42].mxu1  ;;  %3833 = vmatprep.mubr.bf16.mxu0 %v2755_v27  ;;  %3874 = vmatprep.mubr.bf16.mxu1 %v2757_v28 }
 0x8ed   : > { %v2503_v55 = vadd.f32 %v2502_v50, %v2154_v13  ;;  %v2546_v56 = vadd.f32 %v2545_v51, %v2162_v14  ;;  %v2504_v57 = vpop.f32.mrb[43].mxu0  ;;  %v2547_v58 = vpop.f32.mrb[43].mxu1  ;;  %3834 = vmatmul.mubr.bf16.vlgmr.msra.gmra.mrb[52].mxu0 %v2754_v25  ;;  %3875 = vmatmul.mubr.bf16.vlgmr.msra.gmra.mrb[52].mxu1 %v2756_v26  ;;  %v2726_v5 = vmax.f32 %v2499_v34, 0.0  ;;  %v2728_v6 = vmax.f32 %v2542_v35, 0.0 }
 0x8ee   : > { %v2505_v62 = vadd.f32 %v2504_v57, %v2158_v61  ;;  %v2548_v1 = vadd.f32 %v2547_v58, %v2166_v18  ;;  %4913 = vmatpush3.bf16.msra.mxu0 %v5292_v30  ;;  %4935 = vmatpush3.bf16.msra.mxu1 %v5293_v31  ;;  %v2727_v10 = vmax.f32 %v2501_v47, 0.0  ;;  %v2729_v12 = vmax.f32 %v2544_v48, 0.0 }
 0x8ef   : > { %v2742_v7 = vmax.f32 %v2503_v55, 0.0  ;;  %v2744_v20 = vmax.f32 %v2546_v56, 0.0  ;;  %4914 = vmatprep.subr.bf16.mxu0 %v5294_v40  ;;  %4936 = vmatprep.subr.bf16.mxu1 %v5295_v43  ;;  %v2186_v34 = vrot.slane %v6082_v52, %v2153_v59  ;;  %v2190_v35 = vrot.slane %v6082_v52, %v2157_v63  ;;  %v5304_v40 = vld [vmem:[%s5707_s20 + $0x118] sm:$0xff]   ;;  %v5306_v59 = vld [vmem:[%s5707_s20 + $0x160] sm:$0xff]  }
 0x8f0   : > { %v2743_v46 = vmax.f32 %v2505_v62, 0.0  ;;  %v2745_v13 = vmax.f32 %v2548_v1, 0.0  ;;  %v5305_v43 = vld [vmem:[%s5707_s20 + $0x198] sm:$0xff]   ;;  %v5307_v63 = vld [vmem:[%s5707_s20 + $0x1e0] sm:$0xff]  }
 0x8f1   : > { %v6122_v14 = vpack.c.bf16 %v2742_v7, %v2726_v5  ;;  %v6124_v15 = vpack.c.bf16 %v2744_v20, %v2728_v6  ;;  %v5308_v1 = vld [vmem:[%s5707_s20 + $0x120] sm:$0xff]   ;;  %v5310_v7 = vld [vmem:[%s5707_s20 + $0x168] sm:$0xff]  }
 0x8f2   : > { %v2759_v45 = vpack.c.bf16 %v2743_v46, %v2727_v10  ;;  %v2761_v17 = vpack.c.bf16 %v2745_v13, %v2729_v12  ;;  %4915 = vmatpush3.bf16.msra.mxu0 %v5296_v2  ;;  %4937 = vmatpush3.bf16.msra.mxu1 %v5297_v3  ;;  %v2584_v61 = vpop.f32.mrb[44].mxu0  ;;  %v2627_v18 = vpop.f32.mrb[44].mxu1  ;;  %v5309_v2 = vld [vmem:[%s5707_s20 + $0x1a0] sm:$0xff]   ;;  %v5311_v20 = vld [vmem:[%s5707_s20 + $0x1e8] sm:$0xff]  }
 0x8f3   : > { %v2585_v38 = vadd.f32 %v2584_v61, %v2170_v44  ;;  %v2628_v21 = vadd.f32 %v2627_v18, %v2178_v42  ;;  %v2586_v16 = vpop.f32.mrb[45].mxu0  ;;  %v2629_v22 = vpop.f32.mrb[45].mxu1  ;;  %4916 = vmatprep.subr.bf16.mxu0 %v5298_v8  ;;  %4938 = vmatprep.subr.bf16.mxu1 %v5299_v9 }
 0x8f4   : > { %v2587_v25 = vadd.f32 %v2586_v16, %v2174_v60  ;;  %v2630_v26 = vadd.f32 %v2629_v22, %v2182_v54  ;;  %v2588_v27 = vpop.f32.mrb[46].mxu0  ;;  %v2631_v28 = vpop.f32.mrb[46].mxu1  ;;  %3915 = vmatprep.mubr.bf16.mxu0 %v2759_v45  ;;  %3956 = vmatprep.mubr.bf16.mxu1 %v2761_v17 }
 0x8f5   : > { %v2589_v29 = vadd.f32 %v2588_v27, %v2170_v44  ;;  %v2632_v41 = vadd.f32 %v2631_v28, %v2178_v42  ;;  %v2590_v30 = vpop.f32.mrb[47].mxu0  ;;  %v2633_v31 = vpop.f32.mrb[47].mxu1  ;;  %v2198_v44 = vrot.slane %v6082_v52, %v2165_v0  ;;  %v2730_v47 = vmax.f32 %v2585_v38, 0.0 }
 0x8f6   : > { %v2591_v36 = vadd.f32 %v2590_v30, %v2174_v60  ;;  %v2634_v39 = vadd.f32 %v2633_v31, %v2182_v54  ;;  %4917 = vmatpush3.bf16.msra.mxu0 %v5300_v19  ;;  %4939 = vmatpush3.bf16.msra.mxu1 %v5301_v37  ;;  %v2732_v48 = vmax.f32 %v2628_v21, 0.0  ;;  %v2731_v42 = vmax.f32 %v2587_v25, 0.0  ;;  %v5312_v19 = vld [vmem:[%s5707_s20 + $0x128] sm:$0xff]   ;;  %v5316_v31 = vld [vmem:[%s5707_s20 + $0x130] sm:$0xff]  }
 0x8f7   : > { %v2746_v50 = vmax.f32 %v2589_v29, 0.0  ;;  %v2748_v51 = vmax.f32 %v2632_v41, 0.0  ;;  %4918 = vmatprep.subr.bf16.mxu0 %v5302_v23  ;;  %4940 = vmatprep.subr.bf16.mxu1 %v5303_v24  ;;  %v2733_v55 = vmax.f32 %v2630_v26, 0.0  ;;  %v5313_v37 = vld [vmem:[%s5707_s20 + $0x1a8] sm:$0xff]   ;;  %v5314_v23 = vld [vmem:[%s5707_s20 + $0x170] sm:$0xff]  }
 0x8f8   : > { %v2747_v56 = vmax.f32 %v2591_v36, 0.0  ;;  %v2749_v57 = vmax.f32 %v2634_v39, 0.0  ;;  %v5319_v36 = vld [vmem:[%s5707_s20 + $0x1f8] sm:$0xff]  }
 0x8f9   : > { %v6143_v58 = vpack.c.bf16 %v2746_v50, %v2730_v47  ;;  %v6145_v4 = vpack.c.bf16 %v2748_v51, %v2732_v48  ;;  %v5320_v39 = vld [vmem:[%s5707_s20 + $0x138] sm:$0xff]   ;;  %v5324_v47 = vld [vmem:[%s5707_s20 + $0x200] sm:$0xff]   ;;  %v5326_v50 = vld [vmem:[%s5707_s20 + $0x248] sm:$0xff]  }
 0x8fa   : > { %v6147_v52 = vpack.c.bf16 %v2747_v56, %v2731_v42  ;;  %v6149_v0 = vpack.c.bf16 %v2749_v57, %v2733_v55  ;;  %4919 = vmatpush3.bf16.msra.mxu0 %v5304_v40  ;;  %4941 = vmatpush3.bf16.msra.mxu1 %v5305_v43  ;;  %v2670_v60 = vpop.f32.mrb[48].mxu0  ;;  %v2713_v62 = vpop.f32.mrb[48].mxu1  ;;  %v5321_v40 = vld [vmem:[%s5707_s20 + $0x1b8] sm:$0xff]   ;;  %v5322_v43 = vld [vmem:[%s5707_s20 + $0x240] sm:$0xff]   ;;  %v5327_v51 = vld [vmem:[%s5707_s20 + $0x2c8] sm:$0xff]  }
 0x8fb   : > { %v2671_v3 = vadd.f32 %v2670_v60, %v2186_v34  ;;  %v2714_v54 = vadd.f32 %v2713_v62, %v6085_v53  ;;  %v2672_v5 = vpop.f32.mrb[49].mxu0  ;;  %v2715_v6 = vpop.f32.mrb[49].mxu1  ;;  %4920 = vmatprep.subr.bf16.mxu0 %v5306_v59  ;;  %4942 = vmatprep.subr.bf16.mxu1 %v5307_v63  ;;  %v5325_v48 = vld [vmem:[%s5707_s20 + $0x280] sm:$0xff]   ;;  %v5328_v59 = vld [vmem:[%s5707_s20 + $0x208] sm:$0xff]   ;;  %v5330_v42 = vld [vmem:[%s5707_s20 + $0x250] sm:$0xff]  }
 0x8fc   : > { %v2673_v8 = vadd.f32 %v2672_v5, %v2190_v35  ;;  %v2716_v9 = vadd.f32 %v2715_v6, %v2198_v44  ;;  %v2674_v10 = vpop.f32.mrb[50].mxu0  ;;  %v2717_v12 = vpop.f32.mrb[50].mxu1  ;;  %v5329_v63 = vld [vmem:[%s5707_s20 + $0x288] sm:$0xff]   ;;  %v5333_v55 = vld [vmem:[%s5707_s20 + $0x290] sm:$0xff]   ;;  %v5334_v56 = vld [vmem:[%s5707_s20 + $0x258] sm:$0xff]  }
 0x8fd   : > { %v2675_v46 = vadd.f32 %v2674_v10, %v2186_v34  ;;  %v2718_v13 = vadd.f32 %v2717_v12, %v6085_v53  ;;  %v2676_v45 = vpop.f32.mrb[51].mxu0  ;;  %v2719_v17 = vpop.f32.mrb[51].mxu1  ;;  %v2734_v38 = vmax.f32 %v2671_v3, 0.0  ;;  %v2736_v21 = vmax.f32 %v2714_v54, 0.0  ;;  %v5315_v53 = vld [vmem:[%s5707_s20 + $0x1f0] sm:$0xff]   ;;  %v5335_v57 = vld [vmem:[%s5707_s20 + $0x2d8] sm:$0xff]  }
 0x8fe   : > { %v2677_v61 = vadd.f32 %v2676_v45, %v2190_v35  ;;  %v2720_v18 = vadd.f32 %v2719_v17, %v2198_v44  ;;  %4921 = vmatpush3.bf16.msra.mxu0 %v5308_v1  ;;  %4943 = vmatpush3.bf16.msra.mxu1 %v5309_v2  ;;  %v2735_v24 = vmax.f32 %v2673_v8, 0.0  ;;  %v2737_v25 = vmax.f32 %v2716_v9, 0.0  ;;  %v5317_v34 = vld [vmem:[%s5707_s20 + $0x1b0] sm:$0xff]   ;;  %v5318_v35 = vld [vmem:[%s5707_s20 + $0x178] sm:$0xff]   ;;  %v5323_v44 = vld [vmem:[%s5707_s20 + $0x2c0] sm:$0xff]  }
 0x8ff   : > { %v2750_v16 = vmax.f32 %v2675_v46, 0.0  ;;  %v2752_v22 = vmax.f32 %v2718_v13, 0.0  ;;  %4922 = vmatprep.subr.bf16.mxu0 %v5310_v7  ;;  %4944 = vmatprep.subr.bf16.mxu1 %v5311_v20  ;;  %v5338_v60 = vld [vmem:[%s5707_s20 + $0x260] sm:$0xff]   ;;  %v5342_v3 = vld [vmem:[%s5707_s20 + $0x268] sm:$0xff]   ;;  %v5346_v7 = vld [vmem:[%s5707_s20 + $0x270] sm:$0xff]  }
 0x900   : > { %v2751_v26 = vmax.f32 %v2677_v61, 0.0  ;;  %v2753_v27 = vmax.f32 %v2720_v18, 0.0  ;;  %v5339_v62 = vld [vmem:[%s5707_s20 + $0x2e0] sm:$0xff]   ;;  %v5343_v54 = vld [vmem:[%s5707_s20 + $0x2e8] sm:$0xff]   ;;  %v5347_v20 = vld [vmem:[%s5707_s20 + $0x2f0] sm:$0xff]  }
 0x901   : > { %v6161_v28 = vpack.c.bf16 %v2750_v16, %v2734_v38  ;;  %v6163_v29 = vpack.c.bf16 %v2752_v22, %v2736_v21  ;;  %v5340_v1 = vld [vmem:[%s5707_s20 + $0x220] sm:$0xff]   ;;  %v5344_v5 = vld [vmem:[%s5707_s20 + $0x228] sm:$0xff]   ;;  %v5348_v8 = vld [vmem:[%s5707_s20 + $0x230] sm:$0xff]  }
 0x902   : > { %v6165_v41 = vpack.c.bf16 %v2751_v26, %v2735_v24  ;;  %v6167_v30 = vpack.c.bf16 %v2753_v27, %v2737_v25  ;;  %4923 = vmatpush3.bf16.msra.mxu0 %v5312_v19  ;;  %4945 = vmatpush3.bf16.msra.mxu1 %v5313_v37  ;;  %v5341_v2 = vld [vmem:[%s5707_s20 + $0x2a0] sm:$0xff]   ;;  %v5345_v6 = vld [vmem:[%s5707_s20 + $0x2a8] sm:$0xff]   ;;  %v5349_v9 = vld [vmem:[%s5707_s20 + $0x2b0] sm:$0xff]  }
 0x903   : > { %4924 = vmatprep.subr.bf16.mxu0 %v5314_v23  ;;  %4946 = vmatprep.subr.bf16.mxu1 %v5315_v53  ;;  %v5350_v10 = vld [vmem:[%s5707_s20 + $0x278] sm:$0xff]   ;;  %v5354_v45 = vld [vmem:[%s5707_s20 + $0x340] sm:$0xff]   ;;  %v5358_v19 = vld [vmem:[%s5707_s20 + $0x348] sm:$0xff]  }
 0x904   : > { %v5351_v12 = vld [vmem:[%s5707_s20 + $0x2f8] sm:$0xff]   ;;  %v5355_v17 = vld [vmem:[%s5707_s20 + $0x3c0] sm:$0xff]   ;;  %v5359_v37 = vld [vmem:[%s5707_s20 + $0x3c8] sm:$0xff]  }
 0x905   : > { %v5352_v46 = vld [vmem:[%s5707_s20 + $0x238] sm:$0xff]   ;;  %v5356_v61 = vld [vmem:[%s5707_s20 + $0x300] sm:$0xff]   ;;  %v5360_v38 = vld [vmem:[%s5707_s20 + $0x308] sm:$0xff]  }
 0x906   : > { %4925 = vmatpush3.bf16.msra.mxu0 %v5316_v31  ;;  %4947 = vmatpush3.bf16.msra.mxu1 %v5317_v34  ;;  %v5353_v13 = vld [vmem:[%s5707_s20 + $0x2b8] sm:$0xff]   ;;  %v5357_v18 = vld [vmem:[%s5707_s20 + $0x380] sm:$0xff]   ;;  %v5361_v21 = vld [vmem:[%s5707_s20 + $0x388] sm:$0xff]  }
 0x907   : > { %4926 = vmatprep.subr.bf16.mxu0 %v5318_v35  ;;  %4948 = vmatprep.subr.bf16.mxu1 %v5319_v36  ;;  %v5362_v16 = vld [vmem:[%s5707_s20 + $0x350] sm:$0xff]   ;;  %v5366_v23 = vld [vmem:[%s5707_s20 + $0x358] sm:$0xff]   ;;  %v5370_v26 = vld [vmem:[%s5707_s20 + $0x360] sm:$0xff]  }
 0x908   : > { %v5365_v22 = vld [vmem:[%s5707_s20 + $0x390] sm:$0xff]   ;;  %v5367_v53 = vld [vmem:[%s5707_s20 + $0x3d8] sm:$0xff]   ;;  %v5371_v27 = vld [vmem:[%s5707_s20 + $0x3e0] sm:$0xff]  }
 0x909   : > { %v5368_v24 = vld [vmem:[%s5707_s20 + $0x318] sm:$0xff]   ;;  %v5374_v31 = vld [vmem:[%s5707_s20 + $0x368] sm:$0xff]  }
 0x90a   : > { %4927 = vmatpush3.bf16.msra.mxu0 %v5320_v39  ;;  %4949 = vmatpush3.bf16.msra.mxu1 %v5321_v40  ;;  %v5369_v25 = vld [vmem:[%s5707_s20 + $0x398] sm:$0xff]   ;;  %v5375_v34 = vld [vmem:[%s5707_s20 + $0x3e8] sm:$0xff]   ;;  %v5378_v39 = vld [vmem:[%s5707_s20 + $0x370] sm:$0xff]  }
 0x90b   : > { %4956 = vmatprep.subr.bf16.mxu0 %v5322_v43  ;;  %4978 = vmatprep.subr.bf16.mxu1 %v5323_v44  ;;  %v5376_v35 = vld [vmem:[%s5707_s20 + $0x328] sm:$0xff]   ;;  %v5379_v40 = vld [vmem:[%s5707_s20 + $0x3f0] sm:$0xff]  }
 0x90c   : > { %v5377_v36 = vld [vmem:[%s5707_s20 + $0x3a8] sm:$0xff]   ;;  %v5380_v43 = vld [vmem:[%s5707_s20 + $0x330] sm:$0xff]  }
 0x90d   : > { %3916 = vmatmul.mubr.bf16.vlgmr.msra.gmra.mrb[56].mxu0 %v6122_v14  ;;  %3957 = vmatmul.mubr.bf16.vlgmr.msra.gmra.mrb[56].mxu1 %v6124_v15  ;;  %v5331_v14 = vld [vmem:[%s5707_s20 + $0x2d0] sm:$0xff]  }
 0x90e   : > { %4957 = vmatpush3.bf16.msra.mxu0 %v5324_v47  ;;  %3997 = vmatprep.mubr.bf16.mxu0 %v6147_v52  ;;  %v5332_v15 = vld [vmem:[%s5707_s20 + $0x210] sm:$0xff]   ;;  %v5336_v52 = vld [vmem:[%s5707_s20 + $0x218] sm:$0xff]  }
 0x90f   : > { %4979 = vmatpush3.bf16.msra.mxu1 %v5325_v48  ;;  %4038 = vmatprep.mubr.bf16.mxu1 %v6149_v0  ;;  %v5337_v0 = vld [vmem:[%s5707_s20 + $0x298] sm:$0xff]   ;;  %v5381_v44 = vld [vmem:[%s5707_s20 + $0x3b0] sm:$0xff]  }
 0x910   : > { %4958 = vmatprep.subr.bf16.mxu0 %v5326_v50  ;;  %4980 = vmatprep.subr.bf16.mxu1 %v5327_v51  ;;  %v5382_v47 = vld [vmem:[%s5707_s20 + $0x378] sm:$0xff]  }
 0x911   : > { %v5383_v48 = vld [vmem:[%s5707_s20 + $0x3f8] sm:$0xff]  }
 0x912   : > { %4959 = vmatpush3.bf16.msra.mxu0 %v5328_v59  ;;  %v5384_v50 = vld [vmem:[%s5707_s20 + $0x338] sm:$0xff]  }
 0x913   : > { %4981 = vmatpush3.bf16.msra.mxu1 %v5329_v63  ;;  %4960 = vmatprep.subr.bf16.mxu0 %v5330_v42  ;;  %v5385_v51 = vld [vmem:[%s5707_s20 + $0x3b8] sm:$0xff]   ;;  %v4676_v42 = vld [vmem:[%s807_s17] ss:$0 sm:$0xff] }
 0x914   : > { %4982 = vmatprep.subr.bf16.mxu1 %v5331_v14 }
 0x916   : > { %4961 = vmatpush3.bf16.msra.mxu0 %v5332_v15 }
 0x917   : > { %4983 = vmatpush3.bf16.msra.mxu1 %v5333_v55  ;;  %4962 = vmatprep.subr.bf16.mxu0 %v5334_v56 }
 0x918   : > { %4984 = vmatprep.subr.bf16.mxu1 %v5335_v57 }
 0x91a   : > { %4963 = vmatpush3.bf16.msra.mxu0 %v5336_v52 }
 0x91b   : > { %4985 = vmatpush3.bf16.msra.mxu1 %v5337_v0  ;;  %4964 = vmatprep.subr.bf16.mxu0 %v5338_v60 }
 0x91c   : > { %4986 = vmatprep.subr.bf16.mxu1 %v5339_v62 }
 0x91e   : > { %4965 = vmatpush3.bf16.msra.mxu0 %v5340_v1 }
 0x91f   : > { %4987 = vmatpush3.bf16.msra.mxu1 %v5341_v2  ;;  %4966 = vmatprep.subr.bf16.mxu0 %v5342_v3 }
 0x920   : > { %4988 = vmatprep.subr.bf16.mxu1 %v5343_v54 }
 0x922   : > { %4967 = vmatpush3.bf16.msra.mxu0 %v5344_v5 }
 0x923   : > { %4989 = vmatpush3.bf16.msra.mxu1 %v5345_v6  ;;  %4968 = vmatprep.subr.bf16.mxu0 %v5346_v7 }
 0x924   : > { %4990 = vmatprep.subr.bf16.mxu1 %v5347_v20 }
 0x926   : > { %4969 = vmatpush3.bf16.msra.mxu0 %v5348_v8 }
 0x927   : > { %4991 = vmatpush3.bf16.msra.mxu1 %v5349_v9  ;;  %4970 = vmatprep.subr.bf16.mxu0 %v5350_v10 }
 0x928   : > { %4992 = vmatprep.subr.bf16.mxu1 %v5351_v12 }
 0x92a   : > { %4971 = vmatpush3.bf16.msra.mxu0 %v5352_v46 }
 0x92b   : > { %4993 = vmatpush3.bf16.msra.mxu1 %v5353_v13  ;;  %5000 = vmatprep.subr.bf16.mxu0 %v5354_v45 }
 0x92c   : > { %5022 = vmatprep.subr.bf16.mxu1 %v5355_v17 }
 0x92d   : > { %3998 = vmatmul.mubr.bf16.vlgmr.msra.gmra.mrb[60].mxu0 %v6143_v58  ;;  %v5363_v58 = vld [vmem:[%s5707_s20 + $0x3d0] sm:$0xff]  }
 0x92e   : > { %4039 = vmatmul.mubr.bf16.vlgmr.msra.gmra.mrb[60].mxu1 %v6145_v4  ;;  %5001 = vmatpush3.bf16.msra.mxu0 %v5356_v61  ;;  %v5364_v4 = vld [vmem:[%s5707_s20 + $0x310] sm:$0xff]  }
 0x92f   : > { %4079 = vmatprep.mubr.bf16.mxu0 %v6165_v41  ;;  %5023 = vmatpush3.bf16.msra.mxu1 %v5357_v18  ;;  %v5372_v41 = vld [vmem:[%s5707_s20 + $0x320] sm:$0xff]  }
 0x930   : > { %4120 = vmatprep.mubr.bf16.mxu1 %v6167_v30  ;;  %5002 = vmatprep.subr.bf16.mxu0 %v5358_v19  ;;  %v5373_v30 = vld [vmem:[%s5707_s20 + $0x3a0] sm:$0xff]  }
 0x931   : > { %5024 = vmatprep.subr.bf16.mxu1 %v5359_v37 }
 0x932   : > { %5003 = vmatpush3.bf16.msra.mxu0 %v5360_v38 }
 0x933   : > { %5025 = vmatpush3.bf16.msra.mxu1 %v5361_v21  ;;  %5004 = vmatprep.subr.bf16.mxu0 %v5362_v16 }
 0x934   : > { %5026 = vmatprep.subr.bf16.mxu1 %v5363_v58 }
 0x936   : > { %5005 = vmatpush3.bf16.msra.mxu0 %v5364_v4 }
 0x937   : > { %5027 = vmatpush3.bf16.msra.mxu1 %v5365_v22  ;;  %5006 = vmatprep.subr.bf16.mxu0 %v5366_v23 }
 0x938   : > { %5028 = vmatprep.subr.bf16.mxu1 %v5367_v53 }
 0x93a   : > { %5007 = vmatpush3.bf16.msra.mxu0 %v5368_v24 }
 0x93b   : > { %5029 = vmatpush3.bf16.msra.mxu1 %v5369_v25  ;;  %5008 = vmatprep.subr.bf16.mxu0 %v5370_v26 }
 0x93c   : > { %5030 = vmatprep.subr.bf16.mxu1 %v5371_v27 }
 0x93e   : > { %5009 = vmatpush3.bf16.msra.mxu0 %v5372_v41 }
 0x93f   : > { %5031 = vmatpush3.bf16.msra.mxu1 %v5373_v30  ;;  %5010 = vmatprep.subr.bf16.mxu0 %v5374_v31 }
 0x940   : > { %5032 = vmatprep.subr.bf16.mxu1 %v5375_v34 }
 0x942   : > { %5011 = vmatpush3.bf16.msra.mxu0 %v5376_v35 }
 0x943   : > { %5033 = vmatpush3.bf16.msra.mxu1 %v5377_v36  ;;  %5012 = vmatprep.subr.bf16.mxu0 %v5378_v39 }
 0x944   : > { %5034 = vmatprep.subr.bf16.mxu1 %v5379_v40 }
 0x946   : > { %5013 = vmatpush3.bf16.msra.mxu0 %v5380_v43 }
 0x947   : > { %5035 = vmatpush3.bf16.msra.mxu1 %v5381_v44  ;;  %5014 = vmatprep.subr.bf16.mxu0 %v5382_v47 }
 0x948   : > { %5036 = vmatprep.subr.bf16.mxu1 %v5383_v48 }
 0x94a   : > { %5015 = vmatpush3.bf16.msra.mxu0 %v5384_v50 }
 0x94b   : > { %5037 = vmatpush3.bf16.msra.mxu1 %v5385_v51 }
 0x94d   : > { %4080 = vmatmul.mubr.bf16.vlgmr.msra.gmra.mrb[64].mxu0 %v6161_v28 }
 0x94e   : > { %4121 = vmatmul.mubr.bf16.vlgmr.msra.gmra.mrb[64].mxu1 %v6163_v29 }
 0x9c0   : > { %v4884_v59 = vpop.f32.mrb[52].mxu0  ;;  %v4906_v63 = vpop.f32.mrb[52].mxu1 }
 0x9c1   : > { %v4885_v14 = vpop.f32.mrb[53].mxu0  ;;  %v4907_v15 = vpop.f32.mrb[53].mxu1 }
 0x9c2   : > { %v4886_v55 = vadd.f32 %v4885_v14, %v4884_v59  ;;  %v4908_v56 = vadd.f32 %v4907_v15, %v4906_v63  ;;  %v4887_v57 = vpop.f32.mrb[54].mxu0  ;;  %v4909_v52 = vpop.f32.mrb[54].mxu1 }
 0x9c3   : > { %v4888_v0 = vpop.f32.mrb[55].mxu0  ;;  %v4910_v60 = vpop.f32.mrb[55].mxu1 }
 0x9c4   : > { %v3836_v62 = vadd.f32 %v4886_v55, %v4676_v42  ;;  %v4889_v1 = vadd.f32 %v4888_v0, %v4887_v57  ;;  %v4911_v28 = vadd.f32 %v4910_v60, %v4909_v52 }
 0x9c6   : > { %v3877_v2 = vadd.f32 %v4908_v56, %v3836_v62  ;;  %v3839_v29 = vadd.f32 %v4889_v1, %v4676_v42 }
 0x9c8   : > { %v3880_v3 = vadd.f32 %v4911_v28, %v3839_v29 }
 0x9e0   : > { %v4928_v54 = vpop.f32.mrb[56].mxu0  ;;  %v4950_v5 = vpop.f32.mrb[56].mxu1 }
 0x9e1   : > { %v4929_v6 = vpop.f32.mrb[57].mxu0  ;;  %v4951_v7 = vpop.f32.mrb[57].mxu1 }
 0x9e2   : > { %v4930_v20 = vadd.f32 %v4929_v6, %v4928_v54  ;;  %v4952_v8 = vadd.f32 %v4951_v7, %v4950_v5  ;;  %v4931_v9 = vpop.f32.mrb[58].mxu0  ;;  %v4953_v10 = vpop.f32.mrb[58].mxu1 }
 0x9e3   : > { %v4932_v12 = vpop.f32.mrb[59].mxu0  ;;  %v4954_v46 = vpop.f32.mrb[59].mxu1 }
 0x9e4   : > { %v3918_v13 = vadd.f32 %v4930_v20, %v3877_v2  ;;  %v4933_v45 = vadd.f32 %v4932_v12, %v4931_v9  ;;  %v4955_v17 = vadd.f32 %v4954_v46, %v4953_v10 }
 0x9e6   : > { %v3959_v61 = vadd.f32 %v4952_v8, %v3918_v13  ;;  %v3921_v18 = vadd.f32 %v4933_v45, %v3880_v3 }
 0x9e8   : > { %v3962_v19 = vadd.f32 %v4955_v17, %v3921_v18  ;;  %v4805_v17 = vld [vmem:[%s810_s5] ss:$0 sm:$0xff] }
 0xa00   : > { %v4972_v37 = vpop.f32.mrb[60].mxu0 }
 0xa01   : > { %v4994_v38 = vpop.f32.mrb[60].mxu1  ;;  %v4973_v21 = vpop.f32.mrb[61].mxu0 }
 0xa02   : > { %v4974_v16 = vadd.f32 %v4973_v21, %v4972_v37  ;;  %v4995_v58 = vpop.f32.mrb[61].mxu1  ;;  %v4975_v4 = vpop.f32.mrb[62].mxu0  ;;  %v4806_v37 = vld [vmem:[%s6417_s18] ss:$0 sm:$0xff] }
 0xa03   : > { %v4996_v22 = vadd.f32 %v4995_v58, %v4994_v38  ;;  %v4997_v23 = vpop.f32.mrb[62].mxu1  ;;  %v4976_v53 = vpop.f32.mrb[63].mxu0 }
 0xa04   : > { %v4000_v24 = vadd.f32 %v4974_v16, %v3959_v61  ;;  %v4977_v25 = vadd.f32 %v4976_v53, %v4975_v4  ;;  %v4998_v26 = vpop.f32.mrb[63].mxu1 }
 0xa05   : > { %v4999_v27 = vadd.f32 %v4998_v26, %v4997_v23 }
 0xa06   : > { %v4041_v41 = vadd.f32 %v4996_v22, %v4000_v24  ;;  %v4003_v30 = vadd.f32 %v4977_v25, %v3962_v19  ;;  %v4187_v22 = vld [vmem:[%s6418_s30] sm:$0x3] (!%p4807_p6) }
 0xa07   : > { %v4219_v23 = vsel (!%p4807_p6), %vm4218_vm8, %v4187_v22, 0.0  ;;  %v4191_v53 = vrot.slane (!%p4807_p6), %v4187_v22, %v5848_v11  ;;  %v4198_v24 = vrot.slane (!%p4807_p6), %v4187_v22, %v6090_v49 }
 0xa08   : > { %v4044_v31 = vadd.f32 %v4999_v27, %v4003_v30 }
 0xa20   : > { %v5016_v34 = vpop.f32.mrb[64].mxu0 }
 0xa21   : > { %v5038_v35 = vpop.f32.mrb[64].mxu1  ;;  %v5017_v36 = vpop.f32.mrb[65].mxu0 }
 0xa22   : > { %v5018_v39 = vadd.f32 %v5017_v36, %v5016_v34  ;;  %v5039_v40 = vpop.f32.mrb[65].mxu1  ;;  %v5019_v43 = vpop.f32.mrb[66].mxu0 }
 0xa23   : > { %v5040_v44 = vadd.f32 %v5039_v40, %v5038_v35  ;;  %v5041_v47 = vpop.f32.mrb[66].mxu1  ;;  %v5020_v48 = vpop.f32.mrb[67].mxu0 }
 0xa24   : > { %v4082_v50 = vadd.f32 %v5018_v39, %v4041_v41  ;;  %v5021_v51 = vadd.f32 %v5020_v48, %v5019_v43  ;;  %v5042_v59 = vpop.f32.mrb[67].mxu1 }
 0xa25   : > { %v5043_v63 = vadd.f32 %v5042_v59, %v5041_v47 }
 0xa26   : > { %v4123_v42 = vadd.f32 %v5040_v44, %v4082_v50  ;;  %v4085_v14 = vadd.f32 %v5021_v51, %v4044_v31 }
 0xa28   : > { %v4129_v15 = vadd.f32 %v4123_v42, %v6000_v32  ;;  %v4126_v55 = vadd.f32 %v5043_v63, %v4085_v14 }
 0xa2a   : > { %v4130_v56 = vadd.f32 %v4126_v55, %v6002_v33  ;;  %v4131_v57 = vsel %vm963_vm3, %v4129_v15, 0.0  ;;  %v4139_v52 = vmul.f32 %v4129_v15, %v4129_v15 }
 0xa2b   : > { %4132 = vadd.xlane.f32.xlu1 %v4131_v57 }
 0xa2c   : > { %v4134_v0 = vsel %vm963_vm3, %v4130_v56, 0.0  ;;  %v4140_v60 = vmul.f32 %v4130_v56, %v4130_v56  ;;  %v4141_v62 = vsel %vm963_vm3, %v4139_v52, 0.0 }
 0xa2d   : > { %4135 = vadd.xlane.f32.xlu0 %v4134_v0 }
 0xa2e   : > { %v4144_v1 = vsel %vm963_vm3, %v4140_v60, 0.0 }
 0xa2f   : > { %4142 = vadd.xlane.f32.xlu1 %v4141_v62 }
 0xa31   : > { %4145 = vadd.xlane.f32.xlu0 %v4144_v1 }
 0xa35   : > { %4220 = vadd.xlane.f32.xlu0 (!%p4807_p6), %v4219_v23 }
 0xa40   : > { %4193 = vbcast.lane.b32.xlu1 (!%p4807_p6), %v4191_v53, 256 }
 0xa4b   : > { %4200 = vbcast.lane.b32.xlu0 (!%p4807_p6), %v4198_v24, 256 }
 0xab8   : > { %v4133_v28 = vpop.xlane.xlu1 %4132 }
 0xab9   : > { %v4137_v2 = vmul.f32 0.03125, %v4133_v28 }
 0xaba   : > { %v4136_v32 = vpop.xlane.xlu0 %4135 }
 0xabb   : > { %v4138_v29 = vmul.f32 0.03125, %v4136_v32  ;;  %v4149_v33 = vmul.f32 %v4137_v2, %v4137_v2  ;;  %v4155_v13 = vsub.f32 %v4129_v15, %v4137_v2 }
 0xabc   : > { %v4143_v3 = vpop.xlane.xlu1 %4142 }
 0xabd   : > { %v4147_v54 = vmul.f32 0.03125, %v4143_v3  ;;  %v4150_v6 = vmul.f32 %v4138_v29, %v4138_v29  ;;  %v4156_v61 = vsub.f32 %v4130_v56, %v4138_v29 }
 0xabe   : > { %v4146_v5 = vpop.xlane.xlu0 %4145 }
 0xabf   : > { %v4151_v7 = vsub.f32 %v4147_v54, %v4149_v33  ;;  %v4148_v20 = vmul.f32 0.03125, %v4146_v5 }
 0xac0   : > { %v4194_v30 = vpop.permute.xlu1 (!%p4807_p6), %4193 }
 0xac1   : > { %v4153_v8 = vmax.f32 %v4151_v7, 0.0  ;;  %v4152_v9 = vsub.f32 %v4148_v20, %v4150_v6 }
 0xac2   : > { %v4221_v34 = vpop.xlane.xlu0 (!%p4807_p6), %4220 }
 0xac3   : > { %v4157_v10 = vadd.f32 1e-05, %v4153_v8  ;;  %v4154_v12 = vmax.f32 %v4152_v9, 0.0  ;;  %v4222_v8 = vmax.f32 (!%p4807_p6), %v4221_v34, 1.0 }
 0xac5   : > { %5422 = vrsqrt.f32 %v4157_v10  ;;  %v4158_v46 = vadd.f32 1e-05, %v4154_v12 }
 0xac6   : > { %v4201_v11 = vpop.permute.xlu0 (!%p4807_p6), %4200 }
 0xac7   : > { %5424 = vrsqrt.f32 %v4158_v46 }
 0xacf   : > { %v5423_v45 = vpop.eup %5422 }
 0xad0   : > { %v4161_v18 = vmul.f32 %v5423_v45, %v4155_v13 }
 0xad1   : > { %v5425_v19 = vpop.eup %5424 }
 0xad2   : > { %v4170_v38 = vmul.f32 %v4805_v17, %v4161_v18  ;;  %v4162_v21 = vmul.f32 %v5425_v19, %v4156_v61  ;;  %4186 = sbr.rel (%p4807_p6) target bundleno = 3148 (0xc4c), region = 96 }
 0xad4   : > { %v6270_v16 = vadd.f32 %v4806_v37, %v4170_v38  ;;  %v4171_v58 = vmul.f32 %v4805_v17, %v4162_v21 }
 0xad6   : > { %4181 = vst.msk [vmem:[#allocation2] sm:$0xff] %vm963_vm3, %v6270_v16  ;;  %v4180_v4 = vadd.f32 %v4806_v37, %v4171_v58  ;;  %v4256_v25 = vmul.f32 (!%p4807_p6), %v6270_v16, %v6270_v16  ;;  %v4202_v54 = vmul.f32 (!%p4807_p6), %v4194_v30, %v6270_v16 }
 0xad8   : > { %4182 = vst.msk [vmem:[#allocation2 + $0x8] sm:$0xff] %vm963_vm3, %v4180_v4  ;;  %v4258_v26 = vsel (!%p4807_p6), %vm963_vm3, %v4256_v25, 0.0  ;;  %v4257_v27 = vmul.f32 (!%p4807_p6), %v4180_v4, %v4180_v4  ;;  %v4203_v56 = vmul.f32 (!%p4807_p6), %v4201_v11, %v4180_v4  ;;  %v4204_v20 = vsel (!%p4807_p6), %vm963_vm3, %v4202_v54, 0.0 }
 0xad9   : > { %4259 = vadd.xlane.f32.xlu1 %v4258_v26  ;;  %v4205_v9 = vrot.slane %v4204_v20, 4 }
 0xada   : > { %v4261_v41 = vsel %vm963_vm3, %v4257_v27, 0.0  ;;  %v4211_v2 = vsel %vm963_vm3, %v4203_v56, 0.0 }
 0xadb   : > { %4262 = vadd.xlane.f32.xlu0 %v4261_v41  ;;  %v4212_v33 = vrot.slane %v4211_v2, 4  ;;  %v4206_v12 = vadd.f32 %v4205_v9, %v4204_v20 }
 0xadd   : > { %v4213_v7 = vadd.f32 %v4212_v33, %v4211_v2  ;;  %v4207_v13 = vrot.slane %v4206_v12, 2 }
 0xadf   : > { %v4214_v10 = vrot.slane %v4213_v7, 2  ;;  %v4208_v61 = vadd.f32 %v4207_v13, %v4206_v12 }
 0xae1   : > { %v4215_v46 = vadd.f32 %v4214_v10, %v4213_v7  ;;  %v4209_v37 = vrot.slane %v4208_v61, 1 }
 0xae3   : > { %v4216_v45 = vrot.slane %v4215_v46, 1  ;;  %v4210_v21 = vadd.f32 %v4209_v37, %v4208_v61 }
 0xae5   : > { %v4217_v18 = vadd.f32 %v4216_v45, %v4215_v46 }
 0xb66   : > { %v4260_v31 = vpop.xlane.xlu1 %4259 }
 0xb67   : > { %v4264_v35 = vmax.f32 %v4260_v31, 1e-24 }
 0xb68   : > { %v4263_v36 = vpop.xlane.xlu0 %4262 }
 0xb69   : > { %5428 = vrsqrt.f32 %v4264_v35  ;;  %v4265_v39 = vmax.f32 %v4263_v36, 1e-24 }
 0xb6b   : > { %5430 = vrsqrt.f32 %v4265_v39 }
 0xb6c   : > { %5432 = vrcp.f32 %v4222_v8 }
 0xb73   : > { %v5429_v49 = vpop.eup %5428 }
 0xb74   : > { %v4268_v40 = vmul.f32 %v5429_v49, %v6270_v16 }
 0xb75   : > { %v5431_v44 = vpop.eup %5430 }
 0xb76   : > { %v4275_v43 = vrot.slane %v4268_v40, 1  ;;  %v4269_v47 = vmul.f32 %v5431_v44, %v4180_v4  ;;  %v4296_v48 = vrot.slane %v4268_v40, 5  ;;  %v4308_v63 = vrot.slane %v4268_v40, 7  ;;  %v5433_v17 = vpop.eup %5432 }
 0xb77   : > { %v4292_v55 = vrot.slane %v4268_v40, 4  ;;  %v4280_v52 = vrot.slane %v4268_v40, 2  ;;  %v4302_v32 = vrot.slane %v4268_v40, 6  ;;  %v4286_v5 = vrot.slane %v4268_v40, 3 }
 0xb78   : > { %v4276_v50 = vsel %vm4235_vm9, %v4269_v47, %v4275_v43  ;;  %v4297_v51 = vrot.slane %v4269_v47, 4  ;;  %v4281_v59 = vrot.slane %v4269_v47, 1  ;;  %v4309_v42 = vrot.slane %v4269_v47, 6 }
 0xb79   : > { %4277 = vrot.lane.b32.xlu1 %v4276_v50, %s5534_s27  ;;  %v4272_v14 = vrot.slane %v4269_v47, 7  ;;  %v4293_v15 = vrot.slane %v4269_v47, 3  ;;  %v4303_v28 = vrot.slane %v4269_v47, 5  ;;  %v4287_v3 = vrot.slane %v4269_v47, 2 }
 0xb7a   : > { %v4298_v57 = vsel %vm4235_vm9, %v4297_v51, %v4296_v48  ;;  %v4310_v0 = vsel %vm4235_vm9, %v4309_v42, %v4308_v63  ;;  %v4282_v1 = vsel %vm4235_vm9, %v4281_v59, %v4280_v52  ;;  %v4225_v19 = vrot.slane %v5433_v17, 1 }
 0xb7b   : > { %4299 = vrot.lane.b32.xlu0 %v4298_v57, %s5534_s27  ;;  %v4273_v60 = vsel %vm4235_vm9, %v4272_v14, %v4268_v40  ;;  %v4294_v62 = vsel %vm4235_vm9, %v4293_v15, %v4292_v55  ;;  %v4304_v29 = vsel %vm4235_vm9, %v4303_v28, %v4302_v32  ;;  %v4288_v6 = vsel %vm4235_vm9, %v4287_v3, %v4286_v5 }
 0xb7c   : > { %v4229_v38 = vmul.f32 %v4225_v19, %v4217_v18  ;;  %v4228_v58 = vmul.f32 %v5433_v17, %v4210_v21 }
 0xb7d   : > { %4283 = vrot.lane.b32.xlu1 %v4282_v1, %s5535_s19 }
 0xb7e   : > { %v4231_v16 = vmul.f32 %v4229_v38, %v4229_v38  ;;  %v4230_v22 = vmul.f32 %v4228_v58, %v4228_v58 }
 0xb80   : > { %v4234_v4 = vrot.slane %v4231_v16, 7 }
 0xb81   : > { %4305 = vrot.lane.b32.xlu1 %v4304_v29, %s5535_s19 }
 0xb82   : > { %v4236_v23 = vsel %vm4235_vm9, %v4234_v4, %v4230_v22 }
 0xb83   : > { %v4239_v53 = vsel %vm4238_vm10, %v4236_v23, 0.0 }
 0xb85   : > { %4289 = vrot.lane.b32.xlu1 %v4288_v6, %s5536_s28 }
 0xba9   : > { %4240 = vadd.xlane.f32.xlu1 %v4239_v53 }
 0xbba   : > { %4311 = vrot.lane.b32.xlu1 %v4310_v0, %s5536_s28 }
 0xbeb   : > { %v4278_v24 = vpop.permute.xlu1 %4277 }
 0xbec   : > { %v4314_v34 = vsel %vm963_vm3, %v4273_v60, %v4278_v24 }
 0xbed   : > { %v4300_v41 = vpop.permute.xlu0 %4299 }
 0xbee   : > { %v4319_v35 = vsel %vm963_vm3, %v4294_v62, %v4300_v41 }
 0xbef   : > { %v4284_v25 = vpop.permute.xlu1 %4283 }
 0xbf0   : > { %v4316_v11 = vsel %vm4315_vm11, %v4314_v34, %v4284_v25 }
 0xbf3   : > { %v4306_v26 = vpop.permute.xlu1 %4305 }
 0xbf4   : > { %v4320_v36 = vsel %vm4315_vm11, %v4319_v35, %v4306_v26 }
 0xbf7   : > { %v4290_v27 = vpop.permute.xlu1 %4289 }
 0xbf8   : > { %v4318_v49 = vsel %vm4317_vm12, %v4316_v11, %v4290_v27 }
 0xc36   : > { %v4241_v30 = vpop.xlane.xlu1 %4240 }
 0xc37   : > { %v4242_v31 = vmax.f32 %v4241_v30, 1e-24 }
 0xc39   : > { %5434 = vrsqrt.f32 %v4242_v31 }
 0xc3a   : > { %v4312_v39 = vpop.permute.xlu1 %4311 }
 0xc3b   : > { %v4321_v40 = vsel %vm4317_vm12, %v4320_v36, %v4312_v39 }
 0xc3c   : > { %v4324_v43 = vcombine.low %v4318_v49, %v4321_v40 }
 0xc3e   : > { %4808 = vst.sshfl [vmem:[#allocation3] sm:$0x33 pattern:$0x76325410] %v4324_v43 }
 0xc43   : > { %v5435_v44 = vpop.eup %5434 }
 0xc44   : > { %v4245_v47 = vrot.slane %v5435_v44, 1  ;;  %v4248_v50 = vmul.f32 %v5435_v44, %v4228_v58 }
 0xc46   : > { %v4249_v48 = vmul.f32 %v4245_v47, %v4229_v38 }
 0xc48   : > { %v4252_v51 = vrot.slane %v4249_v48, 7 }
 0xc4a   : > { %v4253_v59 = vsel %vm4235_vm9, %v4252_v51, %v4248_v50 }
 0xc4b   : > { %4255 = vst.msk [vmem:[#allocation5] sm:$0x3] %vm4238_vm10, %v4253_v59 }
 0xc4c PF: > { %s6419_s0 = sld [smem:[#allocation10_spill]]  ;;  %s5537_s23 = smov [#allocation3]  }
 0xc4d   : > { %s4344_s1 = sshll.u32 %s5537_s23, 4  ;;  %s5538_s26 = smov [#allocation5]   ;;  %s4345_s1 = int_to_ptr.vmem [resolvable:$true] %s4344_s1 }
 0xc4e   : > { %s4357_s24 = sshll.u32 %s5538_s26, 4  ;;  %s5436_s6 = scalar_lea.vmem %s4345_s1, 64  ;;  %s6309_s24 = int_to_ptr.vmem [resolvable:$true] %s4357_s24 }
 0xc4f   : > { %p5437_p8 = scmp.ne.s32.totalorder %s4345_s1, %s5436_s6  ;;  %p5443_p11 = scmp.lt.s32.totalorder %s4345_s1, %s4345_s1 }
 0xc50   : > { %p5444_p12 = scmp.lt.s32.totalorder %s5436_s6, %s5436_s6 }
 0xc52   : > { %s6420_s29 = sadd.s32 4294967295, %s6419_s0   ;;  %p5445_p13 = por %p5444_p12, %p5443_p11 }
 0xc53   : > { %p6305_p7 = scmp.eq.s32.totalorder %s6420_s29, 1 }
 0xc55   : > { %p5438_p9 = pnand %p5437_p8, %p6305_p7 }
 0xc57   : > { %p5439_p10 = pneg %p5438_p9 }
 0xc59   : > { %p5446_p0 = pnand %p5445_p13, %p5439_p10 }
 0xc5b   : > { %5449 = shalt.err (!%p5446_p0)
}
 0xc5c   : > { %s6422_s20 = sld [smem:[#allocation19_spill]] }
 0xc62   : > { %s5450_s25 = scalar_lea.hbm %s6422_s20, 64 }
 0xc63   : > { %p5451_p1 = scmp.ne.s32.totalorder %s6422_s20, %s5450_s25  ;;  %p5456_p4 = scmp.lt.u32.totalorder %s5450_s25, %s6422_s20 }
 0xc65   : > { %p5452_p2 = pnand %p5451_p1, %p6305_p7 }
 0xc67   : > { %p5453_p3 = pneg %p5452_p2 }
 0xc69   : > { %p5458_p5 = pnand %p5456_p4, %p5453_p3 }
 0xc6b   : > { %5461 = shalt.err (!%p5458_p5)
}
 0xc6c   : > { %5177 = dma.vmem_to_hbm [thread:$0]  (%p6305_p7), %s4345_s1, 64, %s6422_s20, [#allocation4]  }
 0xc6d   : > { %s5462_s19 = scalar_lea.vmem %s6309_s24, 32  ;;  %p5469_p10 = scmp.lt.s32.totalorder %s6309_s24, %s6309_s24 }
 0xc6e   : > { %p5463_p6 = scmp.ne.s32.totalorder %s6309_s24, %s5462_s19  ;;  %p5470_p11 = scmp.lt.s32.totalorder %s5462_s19, %s5462_s19 }
 0xc70   : > { %p5464_p8 = pnand %p5463_p6, %p6305_p7  ;;  %p5471_p12 = por %p5470_p11, %p5469_p10 }
 0xc72   : > { %p5465_p9 = pneg %p5464_p8 }
 0xc74   : > { %p5472_p13 = pnand %p5471_p12, %p5465_p9 }
 0xc76   : > { %5475 = shalt.err (!%p5472_p13)
}
 0xc77   : > { %s6423_s29 = sld [smem:[#allocation20_spill]] }
 0xc7d   : > { %s6424_s23 = smov %s6423_s29  ;;  %s5476_s26 = scalar_lea.hbm %s6423_s29, 32 }
 0xc7e   : > { %p5477_p0 = scmp.ne.s32.totalorder %s6424_s23, %s5476_s26  ;;  %p5482_p3 = scmp.lt.u32.totalorder %s5476_s26, %s6424_s23 }
 0xc80   : > { %p5478_p1 = pnand %p5477_p0, %p6305_p7 }
 0xc82   : > { %p5479_p2 = pneg %p5478_p1 }
 0xc84   : > { %p5484_p4 = pnand %p5482_p3, %p5479_p2 }
 0xc86   : > { %5487 = shalt.err (!%p5484_p4)
}
 0xc87   : > { %5179 = dma.vmem_to_hbm [thread:$0]  (%p6305_p7), %s6309_s24, 32, %s6424_s23, [#allocation6]  }
 0xc88   : > { %5501 = dma.done.wait (%p6305_p7), [#allocation4], 64  }
 0xc89   : > { %5503 = vsyncadd (%p6305_p7), [#allocation4], 4294967232 }
 0xc8a   : > { %5505 = dma.done.wait (%p6305_p7), [#allocation6], 32  }
 0xc8b   : > { %5507 = vsyncadd (%p6305_p7), [#allocation6], 4294967264 }
 0xc8c PF: > { %s6425_s18 = sld [smem:[#allocation10_spill]]  ;;  %s6426_s27 = sld [smem:[#allocation9_spill]] }
 0xc8d   : > { %s6427_s28 = sld [smem:[#allocation11_spill]] }
 0xc92   : > { %s31_s29 = sadd.s32 1, %s6425_s18  }
 0xc93   : > { %p28_p5 = scmp.ge.s32.totalorder %s31_s29, 4  }
 0xc95   :  { %30 = sbr.rel (!%p28_p5) target bundleno = 13 (0xd), region = 175 }
 0xc9c   :  { %4374 = vsyncpa [#allocation4], 1 }
 0xc9d   :  { %4376 = vsyncpa [#allocation4 + $0x1], 1 }
 0xc9e   :  { %4377 = vsyncpa [#allocation6], 1 }

</bundles_post_ra>
